<compile_context>
chip_gen: v7x
topology: tpu7x:2x2x1
jax: 0.10.0
libtpu: 0.0.40
codegen_flags: <defaults>
</compile_context>

<pallas_src>
import jax
import jax.numpy as jnp
import numpy as np
from jax.experimental import pallas as pl
from jax.experimental.pallas import tpu as pltpu

# ----------------------- problem sizes (small, synthetic) -------------------
B = 2                      # batch
CSI_A, CSI_F = 4, 16       # CSI antennas x subcarriers (amp / phase each (B,4,16))
D_HID = 128                # MTN hidden width
C_IMG, IMG_H, IMG_W = 3, 16, 16    # MTN output "image" (NCHW)
C_FEAT = 8                 # backbone feature channels per FPN level
FPN_KEYS = ("p2", "p3", "p4", "p5")
N_LEVELS = len(FPN_KEYS)
HW = IMG_H * IMG_W


def _vmem_spec():
    return pl.BlockSpec(memory_space=pltpu.MemorySpace.VMEM)


# ---------------- cumulative 2x2 average-pool matrices (constants) -----------
def _pool_matrix(h, w):
    """Linear map: row-major (h*w,) -> row-major ((h//2)*(w//2),) 2x2 mean pool."""
    m = np.zeros((h * w, (h // 2) * (w // 2)), np.float32)
    for i in range(h):
        for j in range(w):
            m[i * w + j, (i // 2) * (w // 2) + (j // 2)] = 0.25
    return m


_P16 = _pool_matrix(IMG_H, IMG_W)          # (256, 64)
_P8 = _pool_matrix(IMG_H // 2, IMG_W // 2)  # (64, 16)
_P4 = _pool_matrix(IMG_H // 4, IMG_W // 4)  # (16, 4)
_POOL_P3 = _P16                             # level p3: one 2x2 pool
_POOL_P4 = _P16 @ _P8                       # level p4: two pools (exact composition)
_POOL_P5 = _P16 @ _P8 @ _P4                 # level p5: three pools


# ------------------------------ fused kernel ---------------------------------
def _fused_kernel(x_ref, w1_ref, b1_ref, wo_ref, b2_ref, wsub_ref,
                  pc3_ref, pc4_ref, pc5_ref,
                  t2_ref, t3_ref, t4_ref, t5_ref, o_ref):
    # ---- MTN: merged amp/phase matmul -> relu -> per-channel output matmul ----
    h = jnp.dot(x_ref[...], w1_ref[...], preferred_element_type=jnp.float32)
    h = jnp.maximum(h + b1_ref[...], 0.0)                       # (B, D_HID)

    # Per-channel second matmul + bias, then per-(b, c) min-max normalize
    # (module's `normalize`, including the 1e-5 denominator epsilon).
    xn = []
    for c in range(C_IMG):
        img_c = (jnp.dot(h, wo_ref[:, c * HW:(c + 1) * HW],
                         preferred_element_type=jnp.float32)
                 + b2_ref[:, c * HW:(c + 1) * HW])               # (B, HW)
        mn = jnp.min(img_c, axis=-1, keepdims=True)
        mx = jnp.max(img_c, axis=-1, keepdims=True)
        xn.append((img_c - mn) / (mx - mn + 1e-5))

    # ---- FPN levels: pool (matmul) + 1x1 conv (+ /1000 folded) + MSE accumulate
    pool_refs = (None, pc3_ref, pc4_ref, pc5_ref)
    t_refs = (t2_ref, t3_ref, t4_ref, t5_ref)
    loss = jnp.zeros((1, 1), jnp.float32)
    for k in range(N_LEVELS):
        hw_k = HW // (4 ** k)
        pmat = None if pool_refs[k] is None else pool_refs[k][...]
        s = None
        for c in range(C_IMG):
            pooled = xn[c] if pmat is None else jnp.dot(
                xn[c], pmat, preferred_element_type=jnp.float32)        # (B, hw_k)
            # (C_FEAT*B, B) @ (B, hw_k) -> lane-dense (C_FEAT*B, hw_k) contribution
            contrib = jnp.dot(wsub_ref[k * C_IMG + c], pooled,
                              preferred_element_type=jnp.float32)
            s = contrib if s is None else s + contrib
        d = s - t_refs[k][...]                                           # (C_FEAT*B, hw_k)
        loss = loss + jnp.sum(d * d, keepdims=True) * (1.0 / (B * C_FEAT * hw_k))
    o_ref[...] = loss


# ------------------------------ full forward ---------------------------------
def wifi_densepose_forward(params, amp, phase, teacher_features):
    b = amp.shape[0]
    amp2d = amp.reshape(b, -1).astype(jnp.float32)
    ph2d = phase.reshape(b, -1).astype(jnp.float32)
    x_in = jnp.concatenate([amp2d, ph2d], axis=-1)           # (B, 2*A*F) = (2, 128)

    mtn = params["mtn"]
    w1 = jnp.concatenate([mtn["wa"], mtn["wp"]], axis=0)      # (128, D_HID)

    # Per-(level, in-channel) block conv weights (C_FEAT*B, B) with the
    # forward's /1000 feature scaling folded in (student side only).
    eye_b = jnp.eye(b, dtype=jnp.float32)
    wsub = []
    for key in FPN_KEYS:
        ws = params["backbone"][key].astype(jnp.float32) * (1.0 / 1000.0)  # (Cin, Cout)
        for c in range(C_IMG):
            wsub.append(jnp.kron(ws[c].reshape(C_FEAT, 1), eye_b))         # (16, 2)
    wsub = jnp.stack(wsub, axis=0)                            # (N_LEVELS*C_IMG, 16, 2)

    # Cumulative average-pool matrices (trace-time constants).
    pc3 = jnp.asarray(_POOL_P3)
    pc4 = jnp.asarray(_POOL_P4)
    pc5 = jnp.asarray(_POOL_P5)

    # Teacher features reshaped to (C_FEAT*B, HW_k), channel-major, to match
    # the student rows produced in-kernel.  (Tiny; ~21 KB total.)
    t2d = []
    for key in FPN_KEYS:
        t = teacher_features[key].astype(jnp.float32)         # (B, C_FEAT, Hk, Wk)
        t2d.append(jnp.transpose(t, (1, 0, 2, 3)).reshape(C_FEAT * b, -1))

    # preprocess_mtn (ImageList padding) is a no-op here: H, W already satisfy
    # the size divisibility of the synthetic backbone.
    out = pl.pallas_call(
        _fused_kernel,
        out_shape=jax.ShapeDtypeStruct((1, 1), jnp.float32),
        in_specs=[_vmem_spec() for _ in range(13)],
        out_specs=_vmem_spec(),
    )(x_in, w1, mtn["b1"], mtn["wo"], mtn["b2"], wsub, pc3, pc4, pc5, *t2d)

    # TODO(synk): proposal_generator / roi_heads / Instances max-score selection
    # (the `not transfer_only` branch) have no clean Pallas equivalent.
    return {"loss_transfer": out[0, 0]}


# --------------------------- parameter creation -------------------------------
def init_params(key):
    ks = jax.random.split(key, 9)
    d_in = CSI_A * CSI_F
    d_out = C_IMG * IMG_H * IMG_W
    s = 0.05
    params = {
        "mtn": {
            "wa": jax.random.normal(ks[0], (d_in, D_HID), jnp.float32) * s,
            "wp": jax.random.normal(ks[1], (d_in, D_HID), jnp.float32) * s,
            "b1": jax.random.normal(ks[2], (1, D_HID), jnp.float32) * s,
            "wo": jax.random.normal(ks[3], (D_HID, d_out), jnp.float32) * s,
            "b2": jax.random.normal(ks[4], (1, d_out), jnp.float32) * s,
        },
        "backbone": {
            k: jax.random.normal(ks[5 + i], (C_IMG, C_FEAT), jnp.float32) * s
            for i, k in enumerate(FPN_KEYS)
        },
        # pixel_mean / pixel_std buffers exist in the module but are unused by
        # this forward path (it uses min-max normalize instead).
        "pixel_mean": jnp.array([123.675, 116.28, 103.53], jnp.float32).reshape(3, 1, 1),
        "pixel_std": jnp.array([58.395, 57.12, 57.375], jnp.float32).reshape(3, 1, 1),
    }
    return params


def make_teacher(key):
    teacher = {}
    h, w = IMG_H, IMG_W
    for i, k in enumerate(FPN_KEYS):
        hk, wk = h // (2 ** i), w // (2 ** i)
        key, sub = jax.random.split(key)
        teacher[k] = jax.random.normal(sub, (B, C_FEAT, hk, wk), jnp.float32)
    return teacher


if __name__ == "__main__":
    root = jax.random.PRNGKey(0)
    k_amp, k_ph, k_par, k_teach = jax.random.split(root, 4)

    amp = jax.random.normal(k_amp, (B, CSI_A, CSI_F), jnp.float32)
    phase = jax.random.normal(k_ph, (B, CSI_A, CSI_F), jnp.float32)
    params = init_params(k_par)
    teacher_features = make_teacher(k_teach)

    fwd = jax.jit(wifi_densepose_forward)
    losses = fwd(params, amp, phase, teacher_features)
    jax.block_until_ready(losses)

    print(f"transfer:{float(losses['loss_transfer'])}")  # mirrors module's print
    print("KERNEL_OK")
</pallas_src>

<mosaic_0001>
module attributes {stable_mosaic.version = 11 : i64} {
  func.func @_fused_kernel(%arg0: memref<2x128xf32, #tpu.memory_space<vmem>>, %arg1: memref<128x128xf32, #tpu.memory_space<vmem>>, %arg2: memref<1x128xf32, #tpu.memory_space<vmem>>, %arg3: memref<128x768xf32, #tpu.memory_space<vmem>>, %arg4: memref<1x768xf32, #tpu.memory_space<vmem>>, %arg5: memref<12x16x2xf32, #tpu.memory_space<vmem>>, %arg6: memref<256x64xf32, #tpu.memory_space<vmem>>, %arg7: memref<256x16xf32, #tpu.memory_space<vmem>>, %arg8: memref<256x4xf32, #tpu.memory_space<vmem>>, %arg9: memref<16x256xf32, #tpu.memory_space<vmem>>, %arg10: memref<16x64xf32, #tpu.memory_space<vmem>>, %arg11: memref<16x16xf32, #tpu.memory_space<vmem>>, %arg12: memref<16x4xf32, #tpu.memory_space<vmem>>, %arg13: memref<1x1xf32, #tpu.memory_space<vmem>>) attributes {dimension_semantics = [], scalar_prefetch = 0 : i64, scratch_operands = 0 : i64, tpu.core_type = #tpu.core_type<tc>} {
    %c0 = arith.constant 0 : index
    %c0_0 = arith.constant 0 : index
    %0 = vector.load %arg0[%c0, %c0_0] : memref<2x128xf32, #tpu.memory_space<vmem>>, vector<2x128xf32>
    %c0_1 = arith.constant 0 : index
    %c0_2 = arith.constant 0 : index
    %1 = vector.load %arg1[%c0_1, %c0_2] : memref<128x128xf32, #tpu.memory_space<vmem>>, vector<128x128xf32>
    %cst = arith.constant dense<0.000000e+00> : vector<2x128xf32>
    %2 = tpu.matmul %0, %1, %cst {dimension_numbers = #tpu.dot_dimension_numbers<[1], [0], [0], [1], [0, 0, 1, 1], [], []>} : vector<2x128xf32>, vector<128x128xf32>, vector<2x128xf32> -> vector<2x128xf32>
    %c0_3 = arith.constant 0 : index
    %c0_4 = arith.constant 0 : index
    %3 = vector.load %arg2[%c0_3, %c0_4] : memref<1x128xf32, #tpu.memory_space<vmem>>, vector<1x128xf32>
    %4 = vector.broadcast %3 : vector<1x128xf32> to vector<2x128xf32>
    %5 = arith.addf %2, %4 : vector<2x128xf32>
    %cst_5 = arith.constant 0.000000e+00 : f32
    %6 = vector.broadcast %cst_5 : f32 to vector<2x128xf32>
    %7 = arith.maximumf %5, %6 : vector<2x128xf32>
    %c0_6 = arith.constant 0 : index
    %c0_7 = arith.constant 0 : index
    %8 = vector.load %arg3[%c0_6, %c0_7] : memref<128x768xf32, #tpu.memory_space<vmem>>, vector<128x256xf32>
    %cst_8 = arith.constant dense<0.000000e+00> : vector<2x256xf32>
    %9 = tpu.matmul %7, %8, %cst_8 {dimension_numbers = #tpu.dot_dimension_numbers<[1], [0], [0], [1], [0, 0, 1, 1], [], []>} : vector<2x128xf32>, vector<128x256xf32>, vector<2x256xf32> -> vector<2x256xf32>
    %c0_9 = arith.constant 0 : index
    %c0_10 = arith.constant 0 : index
    %10 = vector.load %arg4[%c0_9, %c0_10] : memref<1x768xf32, #tpu.memory_space<vmem>>, vector<1x256xf32>
    %11 = vector.broadcast %10 : vector<1x256xf32> to vector<2x256xf32>
    %12 = arith.addf %9, %11 : vector<2x256xf32>
    %cst_11 = arith.constant dense<0x7F800000> : vector<2xf32>
    %13 = vector.multi_reduction <minimumf>, %12, %cst_11 [1] : vector<2x256xf32> to vector<2xf32>
    %14 = vector.shape_cast %13 : vector<2xf32> to vector<2x1xf32>
    %cst_12 = arith.constant dense<0xFF800000> : vector<2xf32>
    %15 = vector.multi_reduction <maximumf>, %12, %cst_12 [1] : vector<2x256xf32> to vector<2xf32>
    %16 = vector.shape_cast %15 : vector<2xf32> to vector<2x1xf32>
    %17 = vector.broadcast %14 : vector<2x1xf32> to vector<2x256xf32>
    %18 = arith.subf %12, %17 : vector<2x256xf32>
    %19 = arith.subf %16, %14 : vector<2x1xf32>
    %cst_13 = arith.constant 9.99999974E-6 : f32
    %20 = vector.broadcast %cst_13 : f32 to vector<2x1xf32>
    %21 = arith.addf %19, %20 : vector<2x1xf32>
    %22 = vector.broadcast %21 : vector<2x1xf32> to vector<2x256xf32>
    %23 = arith.divf %18, %22 : vector<2x256xf32>
    %c0_14 = arith.constant 0 : index
    %c256 = arith.constant 256 : index
    %24 = vector.load %arg3[%c0_14, %c256] : memref<128x768xf32, #tpu.memory_space<vmem>>, vector<128x256xf32>
    %cst_15 = arith.constant dense<0.000000e+00> : vector<2x256xf32>
    %25 = tpu.matmul %7, %24, %cst_15 {dimension_numbers = #tpu.dot_dimension_numbers<[1], [0], [0], [1], [0, 0, 1, 1], [], []>} : vector<2x128xf32>, vector<128x256xf32>, vector<2x256xf32> -> vector<2x256xf32>
    %c0_16 = arith.constant 0 : index
    %c256_17 = arith.constant 256 : index
    %26 = vector.load %arg4[%c0_16, %c256_17] : memref<1x768xf32, #tpu.memory_space<vmem>>, vector<1x256xf32>
    %27 = vector.broadcast %26 : vector<1x256xf32> to vector<2x256xf32>
    %28 = arith.addf %25, %27 : vector<2x256xf32>
    %cst_18 = arith.constant dense<0x7F800000> : vector<2xf32>
    %29 = vector.multi_reduction <minimumf>, %28, %cst_18 [1] : vector<2x256xf32> to vector<2xf32>
    %30 = vector.shape_cast %29 : vector<2xf32> to vector<2x1xf32>
    %cst_19 = arith.constant dense<0xFF800000> : vector<2xf32>
    %31 = vector.multi_reduction <maximumf>, %28, %cst_19 [1] : vector<2x256xf32> to vector<2xf32>
    %32 = vector.shape_cast %31 : vector<2xf32> to vector<2x1xf32>
    %33 = vector.broadcast %30 : vector<2x1xf32> to vector<2x256xf32>
    %34 = arith.subf %28, %33 : vector<2x256xf32>
    %35 = arith.subf %32, %30 : vector<2x1xf32>
    %cst_20 = arith.constant 9.99999974E-6 : f32
    %36 = vector.broadcast %cst_20 : f32 to vector<2x1xf32>
    %37 = arith.addf %35, %36 : vector<2x1xf32>
    %38 = vector.broadcast %37 : vector<2x1xf32> to vector<2x256xf32>
    %39 = arith.divf %34, %38 : vector<2x256xf32>
    %c0_21 = arith.constant 0 : index
    %c512 = arith.constant 512 : index
    %40 = vector.load %arg3[%c0_21, %c512] : memref<128x768xf32, #tpu.memory_space<vmem>>, vector<128x256xf32>
    %cst_22 = arith.constant dense<0.000000e+00> : vector<2x256xf32>
    %41 = tpu.matmul %7, %40, %cst_22 {dimension_numbers = #tpu.dot_dimension_numbers<[1], [0], [0], [1], [0, 0, 1, 1], [], []>} : vector<2x128xf32>, vector<128x256xf32>, vector<2x256xf32> -> vector<2x256xf32>
    %c0_23 = arith.constant 0 : index
    %c512_24 = arith.constant 512 : index
    %42 = vector.load %arg4[%c0_23, %c512_24] : memref<1x768xf32, #tpu.memory_space<vmem>>, vector<1x256xf32>
    %43 = vector.broadcast %42 : vector<1x256xf32> to vector<2x256xf32>
    %44 = arith.addf %41, %43 : vector<2x256xf32>
    %cst_25 = arith.constant dense<0x7F800000> : vector<2xf32>
    %45 = vector.multi_reduction <minimumf>, %44, %cst_25 [1] : vector<2x256xf32> to vector<2xf32>
    %46 = vector.shape_cast %45 : vector<2xf32> to vector<2x1xf32>
    %cst_26 = arith.constant dense<0xFF800000> : vector<2xf32>
    %47 = vector.multi_reduction <maximumf>, %44, %cst_26 [1] : vector<2x256xf32> to vector<2xf32>
    %48 = vector.shape_cast %47 : vector<2xf32> to vector<2x1xf32>
    %49 = vector.broadcast %46 : vector<2x1xf32> to vector<2x256xf32>
    %50 = arith.subf %44, %49 : vector<2x256xf32>
    %51 = arith.subf %48, %46 : vector<2x1xf32>
    %cst_27 = arith.constant 9.99999974E-6 : f32
    %52 = vector.broadcast %cst_27 : f32 to vector<2x1xf32>
    %53 = arith.addf %51, %52 : vector<2x1xf32>
    %54 = vector.broadcast %53 : vector<2x1xf32> to vector<2x256xf32>
    %55 = arith.divf %50, %54 : vector<2x256xf32>
    %cst_28 = arith.constant 0.000000e+00 : f32
    %56 = vector.broadcast %cst_28 : f32 to vector<1x1xf32>
    %c0_29 = arith.constant 0 : index
    %c0_30 = arith.constant 0 : index
    %c0_31 = arith.constant 0 : index
    %57 = vector.load %arg5[%c0_29, %c0_30, %c0_31] : memref<12x16x2xf32, #tpu.memory_space<vmem>>, vector<1x16x2xf32>
    %58 = vector.shape_cast %57 : vector<1x16x2xf32> to vector<16x2xf32>
    %cst_32 = arith.constant dense<0.000000e+00> : vector<16x256xf32>
    %59 = tpu.matmul %58, %23, %cst_32 {dimension_numbers = #tpu.dot_dimension_numbers<[1], [0], [0], [1], [0, 0, 1, 1], [], []>} : vector<16x2xf32>, vector<2x256xf32>, vector<16x256xf32> -> vector<16x256xf32>
    %c1 = arith.constant 1 : index
    %c0_33 = arith.constant 0 : index
    %c0_34 = arith.constant 0 : index
    %60 = vector.load %arg5[%c1, %c0_33, %c0_34] : memref<12x16x2xf32, #tpu.memory_space<vmem>>, vector<1x16x2xf32>
    %61 = vector.shape_cast %60 : vector<1x16x2xf32> to vector<16x2xf32>
    %cst_35 = arith.constant dense<0.000000e+00> : vector<16x256xf32>
    %62 = tpu.matmul %61, %39, %cst_35 {dimension_numbers = #tpu.dot_dimension_numbers<[1], [0], [0], [1], [0, 0, 1, 1], [], []>} : vector<16x2xf32>, vector<2x256xf32>, vector<16x256xf32> -> vector<16x256xf32>
    %63 = arith.addf %59, %62 : vector<16x256xf32>
    %c2 = arith.constant 2 : index
    %c0_36 = arith.constant 0 : index
    %c0_37 = arith.constant 0 : index
    %64 = vector.load %arg5[%c2, %c0_36, %c0_37] : memref<12x16x2xf32, #tpu.memory_space<vmem>>, vector<1x16x2xf32>
    %65 = vector.shape_cast %64 : vector<1x16x2xf32> to vector<16x2xf32>
    %cst_38 = arith.constant dense<0.000000e+00> : vector<16x256xf32>
    %66 = tpu.matmul %65, %55, %cst_38 {dimension_numbers = #tpu.dot_dimension_numbers<[1], [0], [0], [1], [0, 0, 1, 1], [], []>} : vector<16x2xf32>, vector<2x256xf32>, vector<16x256xf32> -> vector<16x256xf32>
    %67 = arith.addf %63, %66 : vector<16x256xf32>
    %c0_39 = arith.constant 0 : index
    %c0_40 = arith.constant 0 : index
    %68 = vector.load %arg9[%c0_39, %c0_40] : memref<16x256xf32, #tpu.memory_space<vmem>>, vector<16x256xf32>
    %69 = arith.subf %67, %68 : vector<16x256xf32>
    %70 = arith.mulf %69, %69 : vector<16x256xf32>
    %71 = vector.shape_cast %70 : vector<16x256xf32> to vector<1x16x256xf32>
    %cst_41 = arith.constant dense<0.000000e+00> : vector<1xf32>
    %72 = vector.multi_reduction <add>, %71, %cst_41 [1, 2] : vector<1x16x256xf32> to vector<1xf32>
    %73 = vector.shape_cast %72 : vector<1xf32> to vector<1x1x1xf32>
    %74 = vector.extract %73[0, 0, 0] : f32 from vector<1x1x1xf32>
    %75 = vector.broadcast %74 : f32 to vector<1x1xf32>
    %cst_42 = arith.constant 2.44140625E-4 : f32
    %76 = vector.broadcast %cst_42 : f32 to vector<1x1xf32>
    %77 = arith.mulf %75, %76 : vector<1x1xf32>
    %78 = arith.addf %56, %77 : vector<1x1xf32>
    %c0_43 = arith.constant 0 : index
    %c0_44 = arith.constant 0 : index
    %79 = vector.load %arg6[%c0_43, %c0_44] : memref<256x64xf32, #tpu.memory_space<vmem>>, vector<256x64xf32>
    %cst_45 = arith.constant dense<0.000000e+00> : vector<2x64xf32>
    %80 = tpu.matmul %23, %79, %cst_45 {dimension_numbers = #tpu.dot_dimension_numbers<[1], [0], [0], [1], [0, 0, 1, 1], [], []>} : vector<2x256xf32>, vector<256x64xf32>, vector<2x64xf32> -> vector<2x64xf32>
    %c3 = arith.constant 3 : index
    %c0_46 = arith.constant 0 : index
    %c0_47 = arith.constant 0 : index
    %81 = vector.load %arg5[%c3, %c0_46, %c0_47] : memref<12x16x2xf32, #tpu.memory_space<vmem>>, vector<1x16x2xf32>
    %82 = vector.shape_cast %81 : vector<1x16x2xf32> to vector<16x2xf32>
    %cst_48 = arith.constant dense<0.000000e+00> : vector<16x64xf32>
    %83 = tpu.matmul %82, %80, %cst_48 {dimension_numbers = #tpu.dot_dimension_numbers<[1], [0], [0], [1], [0, 0, 1, 1], [], []>} : vector<16x2xf32>, vector<2x64xf32>, vector<16x64xf32> -> vector<16x64xf32>
    %cst_49 = arith.constant dense<0.000000e+00> : vector<2x64xf32>
    %84 = tpu.matmul %39, %79, %cst_49 {dimension_numbers = #tpu.dot_dimension_numbers<[1], [0], [0], [1], [0, 0, 1, 1], [], []>} : vector<2x256xf32>, vector<256x64xf32>, vector<2x64xf32> -> vector<2x64xf32>
    %c4 = arith.constant 4 : index
    %c0_50 = arith.constant 0 : index
    %c0_51 = arith.constant 0 : index
    %85 = vector.load %arg5[%c4, %c0_50, %c0_51] : memref<12x16x2xf32, #tpu.memory_space<vmem>>, vector<1x16x2xf32>
    %86 = vector.shape_cast %85 : vector<1x16x2xf32> to vector<16x2xf32>
    %cst_52 = arith.constant dense<0.000000e+00> : vector<16x64xf32>
    %87 = tpu.matmul %86, %84, %cst_52 {dimension_numbers = #tpu.dot_dimension_numbers<[1], [0], [0], [1], [0, 0, 1, 1], [], []>} : vector<16x2xf32>, vector<2x64xf32>, vector<16x64xf32> -> vector<16x64xf32>
    %88 = arith.addf %83, %87 : vector<16x64xf32>
    %cst_53 = arith.constant dense<0.000000e+00> : vector<2x64xf32>
    %89 = tpu.matmul %55, %79, %cst_53 {dimension_numbers = #tpu.dot_dimension_numbers<[1], [0], [0], [1], [0, 0, 1, 1], [], []>} : vector<2x256xf32>, vector<256x64xf32>, vector<2x64xf32> -> vector<2x64xf32>
    %c5 = arith.constant 5 : index
    %c0_54 = arith.constant 0 : index
    %c0_55 = arith.constant 0 : index
    %90 = vector.load %arg5[%c5, %c0_54, %c0_55] : memref<12x16x2xf32, #tpu.memory_space<vmem>>, vector<1x16x2xf32>
    %91 = vector.shape_cast %90 : vector<1x16x2xf32> to vector<16x2xf32>
    %cst_56 = arith.constant dense<0.000000e+00> : vector<16x64xf32>
    %92 = tpu.matmul %91, %89, %cst_56 {dimension_numbers = #tpu.dot_dimension_numbers<[1], [0], [0], [1], [0, 0, 1, 1], [], []>} : vector<16x2xf32>, vector<2x64xf32>, vector<16x64xf32> -> vector<16x64xf32>
    %93 = arith.addf %88, %92 : vector<16x64xf32>
    %c0_57 = arith.constant 0 : index
    %c0_58 = arith.constant 0 : index
    %94 = vector.load %arg10[%c0_57, %c0_58] : memref<16x64xf32, #tpu.memory_space<vmem>>, vector<16x64xf32>
    %95 = arith.subf %93, %94 : vector<16x64xf32>
    %96 = arith.mulf %95, %95 : vector<16x64xf32>
    %97 = vector.shape_cast %96 : vector<16x64xf32> to vector<1x16x64xf32>
    %cst_59 = arith.constant dense<0.000000e+00> : vector<1xf32>
    %98 = vector.multi_reduction <add>, %97, %cst_59 [1, 2] : vector<1x16x64xf32> to vector<1xf32>
    %99 = vector.shape_cast %98 : vector<1xf32> to vector<1x1x1xf32>
    %100 = vector.extract %99[0, 0, 0] : f32 from vector<1x1x1xf32>
    %101 = vector.broadcast %100 : f32 to vector<1x1xf32>
    %cst_60 = arith.constant 9.765625E-4 : f32
    %102 = vector.broadcast %cst_60 : f32 to vector<1x1xf32>
    %103 = arith.mulf %101, %102 : vector<1x1xf32>
    %104 = arith.addf %78, %103 : vector<1x1xf32>
    %c0_61 = arith.constant 0 : index
    %c0_62 = arith.constant 0 : index
    %105 = vector.load %arg7[%c0_61, %c0_62] : memref<256x16xf32, #tpu.memory_space<vmem>>, vector<256x16xf32>
    %cst_63 = arith.constant dense<0.000000e+00> : vector<2x16xf32>
    %106 = tpu.matmul %23, %105, %cst_63 {dimension_numbers = #tpu.dot_dimension_numbers<[1], [0], [0], [1], [0, 0, 1, 1], [], []>} : vector<2x256xf32>, vector<256x16xf32>, vector<2x16xf32> -> vector<2x16xf32>
    %c6 = arith.constant 6 : index
    %c0_64 = arith.constant 0 : index
    %c0_65 = arith.constant 0 : index
    %107 = vector.load %arg5[%c6, %c0_64, %c0_65] : memref<12x16x2xf32, #tpu.memory_space<vmem>>, vector<1x16x2xf32>
    %108 = vector.shape_cast %107 : vector<1x16x2xf32> to vector<16x2xf32>
    %cst_66 = arith.constant dense<0.000000e+00> : vector<16x16xf32>
    %109 = tpu.matmul %108, %106, %cst_66 {dimension_numbers = #tpu.dot_dimension_numbers<[1], [0], [0], [1], [0, 0, 1, 1], [], []>} : vector<16x2xf32>, vector<2x16xf32>, vector<16x16xf32> -> vector<16x16xf32>
    %cst_67 = arith.constant dense<0.000000e+00> : vector<2x16xf32>
    %110 = tpu.matmul %39, %105, %cst_67 {dimension_numbers = #tpu.dot_dimension_numbers<[1], [0], [0], [1], [0, 0, 1, 1], [], []>} : vector<2x256xf32>, vector<256x16xf32>, vector<2x16xf32> -> vector<2x16xf32>
    %c7 = arith.constant 7 : index
    %c0_68 = arith.constant 0 : index
    %c0_69 = arith.constant 0 : index
    %111 = vector.load %arg5[%c7, %c0_68, %c0_69] : memref<12x16x2xf32, #tpu.memory_space<vmem>>, vector<1x16x2xf32>
    %112 = vector.shape_cast %111 : vector<1x16x2xf32> to vector<16x2xf32>
    %cst_70 = arith.constant dense<0.000000e+00> : vector<16x16xf32>
    %113 = tpu.matmul %112, %110, %cst_70 {dimension_numbers = #tpu.dot_dimension_numbers<[1], [0], [0], [1], [0, 0, 1, 1], [], []>} : vector<16x2xf32>, vector<2x16xf32>, vector<16x16xf32> -> vector<16x16xf32>
    %114 = arith.addf %109, %113 : vector<16x16xf32>
    %cst_71 = arith.constant dense<0.000000e+00> : vector<2x16xf32>
    %115 = tpu.matmul %55, %105, %cst_71 {dimension_numbers = #tpu.dot_dimension_numbers<[1], [0], [0], [1], [0, 0, 1, 1], [], []>} : vector<2x256xf32>, vector<256x16xf32>, vector<2x16xf32> -> vector<2x16xf32>
    %c8 = arith.constant 8 : index
    %c0_72 = arith.constant 0 : index
    %c0_73 = arith.constant 0 : index
    %116 = vector.load %arg5[%c8, %c0_72, %c0_73] : memref<12x16x2xf32, #tpu.memory_space<vmem>>, vector<1x16x2xf32>
    %117 = vector.shape_cast %116 : vector<1x16x2xf32> to vector<16x2xf32>
    %cst_74 = arith.constant dense<0.000000e+00> : vector<16x16xf32>
    %118 = tpu.matmul %117, %115, %cst_74 {dimension_numbers = #tpu.dot_dimension_numbers<[1], [0], [0], [1], [0, 0, 1, 1], [], []>} : vector<16x2xf32>, vector<2x16xf32>, vector<16x16xf32> -> vector<16x16xf32>
    %119 = arith.addf %114, %118 : vector<16x16xf32>
    %c0_75 = arith.constant 0 : index
    %c0_76 = arith.constant 0 : index
    %120 = vector.load %arg11[%c0_75, %c0_76] : memref<16x16xf32, #tpu.memory_space<vmem>>, vector<16x16xf32>
    %121 = arith.subf %119, %120 : vector<16x16xf32>
    %122 = arith.mulf %121, %121 : vector<16x16xf32>
    %123 = vector.shape_cast %122 : vector<16x16xf32> to vector<1x16x16xf32>
    %cst_77 = arith.constant dense<0.000000e+00> : vector<1xf32>
    %124 = vector.multi_reduction <add>, %123, %cst_77 [1, 2] : vector<1x16x16xf32> to vector<1xf32>
    %125 = vector.shape_cast %124 : vector<1xf32> to vector<1x1x1xf32>
    %126 = vector.extract %125[0, 0, 0] : f32 from vector<1x1x1xf32>
    %127 = vector.broadcast %126 : f32 to vector<1x1xf32>
    %cst_78 = arith.constant 3.906250e-03 : f32
    %128 = vector.broadcast %cst_78 : f32 to vector<1x1xf32>
    %129 = arith.mulf %127, %128 : vector<1x1xf32>
    %130 = arith.addf %104, %129 : vector<1x1xf32>
    %c0_79 = arith.constant 0 : index
    %c0_80 = arith.constant 0 : index
    %131 = vector.load %arg8[%c0_79, %c0_80] : memref<256x4xf32, #tpu.memory_space<vmem>>, vector<256x4xf32>
    %cst_81 = arith.constant dense<0.000000e+00> : vector<2x4xf32>
    %132 = tpu.matmul %23, %131, %cst_81 {dimension_numbers = #tpu.dot_dimension_numbers<[1], [0], [0], [1], [0, 0, 1, 1], [], []>} : vector<2x256xf32>, vector<256x4xf32>, vector<2x4xf32> -> vector<2x4xf32>
    %c9 = arith.constant 9 : index
    %c0_82 = arith.constant 0 : index
    %c0_83 = arith.constant 0 : index
    %133 = vector.load %arg5[%c9, %c0_82, %c0_83] : memref<12x16x2xf32, #tpu.memory_space<vmem>>, vector<1x16x2xf32>
    %134 = vector.shape_cast %133 : vector<1x16x2xf32> to vector<16x2xf32>
    %cst_84 = arith.constant dense<0.000000e+00> : vector<16x4xf32>
    %135 = tpu.matmul %134, %132, %cst_84 {dimension_numbers = #tpu.dot_dimension_numbers<[1], [0], [0], [1], [0, 0, 1, 1], [], []>} : vector<16x2xf32>, vector<2x4xf32>, vector<16x4xf32> -> vector<16x4xf32>
    %cst_85 = arith.constant dense<0.000000e+00> : vector<2x4xf32>
    %136 = tpu.matmul %39, %131, %cst_85 {dimension_numbers = #tpu.dot_dimension_numbers<[1], [0], [0], [1], [0, 0, 1, 1], [], []>} : vector<2x256xf32>, vector<256x4xf32>, vector<2x4xf32> -> vector<2x4xf32>
    %c10 = arith.constant 10 : index
    %c0_86 = arith.constant 0 : index
    %c0_87 = arith.constant 0 : index
    %137 = vector.load %arg5[%c10, %c0_86, %c0_87] : memref<12x16x2xf32, #tpu.memory_space<vmem>>, vector<1x16x2xf32>
    %138 = vector.shape_cast %137 : vector<1x16x2xf32> to vector<16x2xf32>
    %cst_88 = arith.constant dense<0.000000e+00> : vector<16x4xf32>
    %139 = tpu.matmul %138, %136, %cst_88 {dimension_numbers = #tpu.dot_dimension_numbers<[1], [0], [0], [1], [0, 0, 1, 1], [], []>} : vector<16x2xf32>, vector<2x4xf32>, vector<16x4xf32> -> vector<16x4xf32>
    %140 = arith.addf %135, %139 : vector<16x4xf32>
    %cst_89 = arith.constant dense<0.000000e+00> : vector<2x4xf32>
    %141 = tpu.matmul %55, %131, %cst_89 {dimension_numbers = #tpu.dot_dimension_numbers<[1], [0], [0], [1], [0, 0, 1, 1], [], []>} : vector<2x256xf32>, vector<256x4xf32>, vector<2x4xf32> -> vector<2x4xf32>
    %c11 = arith.constant 11 : index
    %c0_90 = arith.constant 0 : index
    %c0_91 = arith.constant 0 : index
    %142 = vector.load %arg5[%c11, %c0_90, %c0_91] : memref<12x16x2xf32, #tpu.memory_space<vmem>>, vector<1x16x2xf32>
    %143 = vector.shape_cast %142 : vector<1x16x2xf32> to vector<16x2xf32>
    %cst_92 = arith.constant dense<0.000000e+00> : vector<16x4xf32>
    %144 = tpu.matmul %143, %141, %cst_92 {dimension_numbers = #tpu.dot_dimension_numbers<[1], [0], [0], [1], [0, 0, 1, 1], [], []>} : vector<16x2xf32>, vector<2x4xf32>, vector<16x4xf32> -> vector<16x4xf32>
    %145 = arith.addf %140, %144 : vector<16x4xf32>
    %c0_93 = arith.constant 0 : index
    %c0_94 = arith.constant 0 : index
    %146 = vector.load %arg12[%c0_93, %c0_94] : memref<16x4xf32, #tpu.memory_space<vmem>>, vector<16x4xf32>
    %147 = arith.subf %145, %146 : vector<16x4xf32>
    %148 = arith.mulf %147, %147 : vector<16x4xf32>
    %149 = vector.shape_cast %148 : vector<16x4xf32> to vector<1x16x4xf32>
    %cst_95 = arith.constant dense<0.000000e+00> : vector<1xf32>
    %150 = vector.multi_reduction <add>, %149, %cst_95 [1, 2] : vector<1x16x4xf32> to vector<1xf32>
    %151 = vector.shape_cast %150 : vector<1xf32> to vector<1x1x1xf32>
    %152 = vector.extract %151[0, 0, 0] : f32 from vector<1x1x1xf32>
    %153 = vector.broadcast %152 : f32 to vector<1x1xf32>
    %cst_96 = arith.constant 1.562500e-02 : f32
    %154 = vector.broadcast %cst_96 : f32 to vector<1x1xf32>
    %155 = arith.mulf %153, %154 : vector<1x1xf32>
    %156 = arith.addf %130, %155 : vector<1x1xf32>
    %c0_97 = arith.constant 0 : index
    %c0_98 = arith.constant 0 : index
    %157 = vector.load %arg13[%c0_97, %c0_98] : memref<1x1xf32, #tpu.memory_space<vmem>>, vector<1x1xf32>
    tpu.vector_store %arg13[%c0_97, %c0_98], %156 {strides = array<i32>} : memref<1x1xf32, #tpu.memory_space<vmem>>, vector<1x1xf32>,
    return
  }
}

</mosaic_0001>

<bundles_post_ra>
// kernel: wifi_densepose_forward.1
= control target key start
LH: loop header
LB: loop body
LE: loop exit
PB: predicated region body
PF: predicated region fallthrough
CT: control target
= control target key end

     0   :  { %v3412_v3 = vmov 0.0|0.0   ;;  %vm3413_vm0 = vmmov 0   ;;  %v3414_v6 = vmov 0.0   ;;  %s4637_s0 = inlined_call_operand.vmem [shape: f32[2,128], index: 0, kind: input, shape index: {}]   ;;  %s4638_s1 = inlined_call_operand.vmem [shape: f32[128,128], index: 1, kind: input, shape index: {}]   ;;  %s4639_s2 = inlined_call_operand.vmem [shape: f32[1,128], index: 2, kind: input, shape index: {}]   ;;  %s4640_s3 = inlined_call_operand.vmem [shape: f32[128,768], index: 3, kind: input, shape index: {}]   ;;  %s4641_s4 = inlined_call_operand.vmem [shape: f32[1,768], index: 4, kind: input, shape index: {}]   ;;  %s4642_s5 = inlined_call_operand.vmem [shape: f32[12,16,2], index: 5, kind: input, shape index: {}]   ;;  %s4643_s6 = inlined_call_operand.vmem [shape: f32[256,64], index: 6, kind: input, shape index: {}]   ;;  %s4644_s7 = inlined_call_operand.vmem [shape: f32[256,16], index: 7, kind: input, shape index: {}]   ;;  %s4645_s8 = inlined_call_operand.vmem [shape: f32[256,4], index: 8, kind: input, shape index: {}]   ;;  %s4646_s9 = inlined_call_operand.vmem [shape: f32[16,256], index: 9, kind: input, shape index: {}]   ;;  %s4647_s10 = inlined_call_operand.vmem [shape: f32[16,64], index: 10, kind: input, shape index: {}]   ;;  %s4648_s11 = inlined_call_operand.vmem [shape: f32[16,16], index: 11, kind: input, shape index: {}]   ;;  %s4649_s12 = inlined_call_operand.vmem [shape: f32[16,4], index: 12, kind: input, shape index: {}]   ;;  %s4650_s13 = inlined_call_operand.hbm [shape: f32[1,1], index: 13, kind: output, shape index: {}]  }
   0x1   :  { %v46_v0 = vld [vmem:[%s4638_s1] sm:$0xff]  ;;  %v47_v1 = vld [vmem:[%s4638_s1 + $0x8] sm:$0xff]  ;;  %v48_v2 = vld [vmem:[%s4638_s1 + $0x10] sm:$0xff]  ;;  %2942 = vmatprep.subr.bf16.mxu0 %v3412_v3  ;;  %2894 = vmatprep.mubr.msk.f32.mxu0 %vm3413_vm0, %v3414_v6 }
   0x2   :  { %v2943_v4 = vpack.c.bf16 %v47_v1, %v46_v0  ;;  %v49_v5 = vld [vmem:[%s4638_s1 + $0x18] sm:$0xff]  ;;  %248 = vmatprep.mubr.f32.mxu1 %v3414_v6  ;;  %v50_v8 = vld [vmem:[%s4638_s1 + $0x20] sm:$0xff]  ;;  %v51_v9 = vld [vmem:[%s4638_s1 + $0x28] sm:$0xff] }
   0x3   :  { %v2946_v7 = vpack.c.bf16 %v49_v5, %v48_v2  ;;  %v141_v10 = vld [vmem:[%s4640_s3 + $0x8] sm:$0xff]  ;;  %v143_v11 = vld [vmem:[%s4640_s3 + $0x38] sm:$0xff]  ;;  %v140_v12 = vld [vmem:[%s4640_s3] sm:$0xff]  ;;  %v2949_v14 = vpack.c.bf16 %v51_v9, %v50_v8 }
   0x4   :  { %2944 = vmatpush3.bf16.msra.mxu0 %v2943_v4  ;;  %v142_v13 = vld [vmem:[%s4640_s3 + $0x30] sm:$0xff]  ;;  %v2966_v16 = vpack.c.bf16 %v143_v11, %v141_v10  ;;  %v53_v18 = vld [vmem:[%s4638_s1 + $0x38] sm:$0xff]  ;;  %v145_v19 = vld [vmem:[%s4640_s3 + $0x68] sm:$0xff] }
   0x5   :  { %2945 = vmatprep.subr.bf16.mxu0 %v3412_v3  ;;  %v52_v15 = vld [vmem:[%s4638_s1 + $0x30] sm:$0xff]  ;;  %v2968_v17 = vpack.c.bf16 %v142_v13, %v140_v12  ;;  %v147_v20 = vld [vmem:[%s4640_s3 + $0x98] sm:$0xff]  ;;  %v144_v22 = vld [vmem:[%s4640_s3 + $0x60] sm:$0xff] }
   0x6   :  { %2967 = vmatprep.subr.bf16.mxu1 %v2966_v16  ;;  %v2970_v21 = vpack.c.bf16 %v147_v20, %v145_v19  ;;  %v146_v23 = vld [vmem:[%s4640_s3 + $0x90] sm:$0xff]  ;;  %v2952_v25 = vpack.c.bf16 %v53_v18, %v52_v15  ;;  %v149_v26 = vld [vmem:[%s4640_s3 + $0xc8] sm:$0xff]  ;;  %v151_v27 = vld [vmem:[%s4640_s3 + $0xf8] sm:$0xff] }
   0x7   :  { %2969 = vmatpush1.bf16.msra.mxu1 %v2968_v17  ;;  %v2972_v24 = vpack.c.bf16 %v146_v23, %v144_v22  ;;  %v148_v28 = vld [vmem:[%s4640_s3 + $0xc0] sm:$0xff]  ;;  %v55_v30 = vld [vmem:[%s4638_s1 + $0x48] sm:$0xff]  ;;  %v2974_v31 = vpack.c.bf16 %v151_v27, %v149_v26  ;;  %v150_v32 = vld [vmem:[%s4640_s3 + $0xf0] sm:$0xff] }
   0x8   :  { %2947 = vmatpush3.bf16.msra.mxu0 %v2946_v7  ;;  %2971 = vmatprep.subr.bf16.mxu1 %v2970_v21  ;;  %v54_v29 = vld [vmem:[%s4638_s1 + $0x40] sm:$0xff]  ;;  %v153_v33 = vld [vmem:[%s4640_s3 + $0x128] sm:$0xff]  ;;  %v2976_v34 = vpack.c.bf16 %v150_v32, %v148_v28  ;;  %v155_v35 = vld [vmem:[%s4640_s3 + $0x158] sm:$0xff] }
   0x9   :  { %2948 = vmatprep.subr.bf16.mxu0 %v3412_v3  ;;  %v2955_v36 = vpack.c.bf16 %v55_v30, %v54_v29  ;;  %v56_v37 = vld [vmem:[%s4638_s1 + $0x50] sm:$0xff]  ;;  %v2978_v38 = vpack.c.bf16 %v155_v35, %v153_v33  ;;  %v152_v39 = vld [vmem:[%s4640_s3 + $0x120] sm:$0xff]  ;;  %v57_v41 = vld [vmem:[%s4638_s1 + $0x58] sm:$0xff] }
   0xa   :  { %v154_v40 = vld [vmem:[%s4640_s3 + $0x150] sm:$0xff]  ;;  %v157_v42 = vld [vmem:[%s4640_s3 + $0x188] sm:$0xff]  ;;  %v159_v43 = vld [vmem:[%s4640_s3 + $0x1b8] sm:$0xff]  ;;  %v2958_v45 = vpack.c.bf16 %v57_v41, %v56_v37 }
   0xb   :  { %2973 = vmatpush1.bf16.msra.mxu1 %v2972_v24  ;;  %v2980_v44 = vpack.c.bf16 %v154_v40, %v152_v39  ;;  %v58_v46 = vld [vmem:[%s4638_s1 + $0x60] sm:$0xff]  ;;  %v2982_v47 = vpack.c.bf16 %v159_v43, %v157_v42  ;;  %v158_v49 = vld [vmem:[%s4640_s3 + $0x1b0] sm:$0xff]  ;;  %v59_v50 = vld [vmem:[%s4638_s1 + $0x68] sm:$0xff] }
   0xc   :  { %2950 = vmatpush3.bf16.msra.mxu0 %v2949_v14  ;;  %2975 = vmatprep.subr.bf16.mxu1 %v2974_v31  ;;  %v156_v48 = vld [vmem:[%s4640_s3 + $0x180] sm:$0xff]  ;;  %v161_v51 = vld [vmem:[%s4640_s3 + $0x1e8] sm:$0xff]  ;;  %v163_v52 = vld [vmem:[%s4640_s3 + $0x218] sm:$0xff]  ;;  %v2961_v55 = vpack.c.bf16 %v59_v50, %v58_v46 }
   0xd   :  { %2951 = vmatprep.subr.bf16.mxu0 %v3412_v3  ;;  %v60_v53 = vld [vmem:[%s4638_s1 + $0x70] sm:$0xff]  ;;  %v2984_v54 = vpack.c.bf16 %v158_v49, %v156_v48  ;;  %v61_v56 = vld [vmem:[%s4638_s1 + $0x78] sm:$0xff]  ;;  %v2986_v57 = vpack.c.bf16 %v163_v52, %v161_v51  ;;  %v160_v58 = vld [vmem:[%s4640_s3 + $0x1e0] sm:$0xff] }
   0xe   :  { %v162_v59 = vld [vmem:[%s4640_s3 + $0x210] sm:$0xff]  ;;  %v165_v60 = vld [vmem:[%s4640_s3 + $0x248] sm:$0xff]  ;;  %v167_v61 = vld [vmem:[%s4640_s3 + $0x278] sm:$0xff] }
   0xf   :  { %2977 = vmatpush1.bf16.msra.mxu1 %v2976_v34 }
  0x10   :  { %2953 = vmatpush3.bf16.msra.mxu0 %v2952_v25  ;;  %2979 = vmatprep.subr.bf16.mxu1 %v2978_v38 }
  0x11   :  { %2954 = vmatprep.subr.bf16.mxu0 %v3412_v3 }
  0x13   :  { %2981 = vmatpush1.bf16.msra.mxu1 %v2980_v44 }
  0x14   :  { %2956 = vmatpush3.bf16.msra.mxu0 %v2955_v36  ;;  %2983 = vmatprep.subr.bf16.mxu1 %v2982_v47 }
  0x15   :  { %2957 = vmatprep.subr.bf16.mxu0 %v3412_v3 }
  0x18   :  { %2959 = vmatpush3.bf16.msra.mxu0 %v2958_v45 }
  0x19   :  { %2960 = vmatprep.subr.bf16.mxu0 %v3412_v3 }
  0x1a   :  { %18 = vsyncpa [#allocation3], 0  ;;  %v274_v62 = vld [vmem:[%s4640_s3 + $0x18] sm:$0xff]  ;;  %v276_v63 = vld [vmem:[%s4640_s3 + $0x48] sm:$0xff]  ;;  %2985 = vmatpush1.bf16.msra.mxu1 %v2984_v54  ;;  %v2988_v0 = vpack.c.bf16 %v162_v59, %v160_v58  ;;  %v2964_v1 = vpack.c.bf16 %v61_v56, %v60_v53  ;;  %v2990_v2 = vpack.c.bf16 %v167_v61, %v165_v60  ;;  %vm255_vm1 = vcmask 1041408   ;;  %s3415_s20 = smov [#allocation2]  }
  0x1b   :  { %2987 = vmatprep.subr.bf16.mxu1 %v2986_v57  ;;  %v164_v4 = vld [vmem:[%s4640_s3 + $0x240] sm:$0xff]  ;;  %v166_v5 = vld [vmem:[%s4640_s3 + $0x270] sm:$0xff]  ;;  %v2998_v7 = vpack.c.bf16 %v276_v63, %v274_v62  ;;  %v278_v10 = vld [vmem:[%s4640_s3 + $0x78] sm:$0xff]  ;;  %vm542_vm2 = vcmask 15360   ;;  %vm1355_vm3 = vcmask 523264   ;;  %vm1882_vm4 = vcmask 130048  }
  0x1c   :  { %2962 = vmatpush3.bf16.msra.mxu0 %v2961_v55  ;;  %v273_v8 = vld [vmem:[%s4640_s3 + $0x10] sm:$0xff]  ;;  %v275_v9 = vld [vmem:[%s4640_s3 + $0x40] sm:$0xff]  ;;  %v280_v11 = vld [vmem:[%s4640_s3 + $0xa8] sm:$0xff]  ;;  %v2992_v12 = vpack.c.bf16 %v166_v5, %v164_v4  ;;  %vm2409_vm5 = vcmask 31744   ;;  %s2433_s21 = sshll.u32 %s3415_s20, 4  ;;  %vm2425_vm6 = vcmask 0   ;;  %s2434_s21 = int_to_ptr.vmem [resolvable:$true] %s2433_s21 }
  0x1d   :  { %2963 = vmatprep.subr.bf16.mxu0 %v3412_v3  ;;  %v45_v3 = vld [vmem:[%s4637_s0] sm:$0x3]  ;;  %v3000_v13 = vpack.c.bf16 %v275_v9, %v273_v8  ;;  %v3002_v14 = vpack.c.bf16 %v280_v11, %v278_v10  ;;  %v277_v15 = vld [vmem:[%s4640_s3 + $0x70] sm:$0xff]  ;;  %v282_v17 = vld [vmem:[%s4640_s3 + $0xd8] sm:$0xff]  ;;  %p3393_p1 = scmp.lt.s32.totalorder %s2434_s21, %s2434_s21 }
  0x1e   :  { %2989 = vmatpush1.bf16.msra.mxu1 %v2988_v0  ;;  %v279_v16 = vld [vmem:[%s4640_s3 + $0xa0] sm:$0xff]  ;;  %v284_v18 = vld [vmem:[%s4640_s3 + $0x108] sm:$0xff]  ;;  %v281_v21 = vld [vmem:[%s4640_s3 + $0xd0] sm:$0xff] }
  0x1f   :  { %2991 = vmatprep.subr.bf16.mxu1 %v2990_v2  ;;  %v3004_v19 = vpack.c.bf16 %v279_v16, %v277_v15  ;;  %v3006_v20 = vpack.c.bf16 %v284_v18, %v282_v17  ;;  %v283_v22 = vld [vmem:[%s4640_s3 + $0x100] sm:$0xff]  ;;  %v286_v23 = vld [vmem:[%s4640_s3 + $0x138] sm:$0xff]  ;;  %v288_v24 = vld [vmem:[%s4640_s3 + $0x168] sm:$0xff] }
  0x20   :  { %2965 = vmatpush3.bf16.msra.mxu0 %v2964_v1  ;;  %v3008_v25 = vpack.c.bf16 %v283_v22, %v281_v21  ;;  %v3010_v26 = vpack.c.bf16 %v288_v24, %v286_v23  ;;  %v285_v27 = vld [vmem:[%s4640_s3 + $0x130] sm:$0xff]  ;;  %v287_v28 = vld [vmem:[%s4640_s3 + $0x160] sm:$0xff]  ;;  %v290_v29 = vld [vmem:[%s4640_s3 + $0x198] sm:$0xff] }
  0x21   :  { %2999 = vmatprep.subr.bf16.mxu0 %v2998_v7  ;;  %v292_v30 = vld [vmem:[%s4640_s3 + $0x1c8] sm:$0xff]  ;;  %v3012_v31 = vpack.c.bf16 %v287_v28, %v285_v27  ;;  %v289_v33 = vld [vmem:[%s4640_s3 + $0x190] sm:$0xff]  ;;  %v291_v34 = vld [vmem:[%s4640_s3 + $0x1c0] sm:$0xff] }
  0x22   :  { %2993 = vmatpush1.bf16.msra.mxu1 %v2992_v12  ;;  %v3014_v32 = vpack.c.bf16 %v292_v30, %v290_v29  ;;  %v294_v35 = vld [vmem:[%s4640_s3 + $0x1f8] sm:$0xff]  ;;  %v296_v36 = vld [vmem:[%s4640_s3 + $0x228] sm:$0xff]  ;;  %v3016_v37 = vpack.c.bf16 %v291_v34, %v289_v33  ;;  %v293_v39 = vld [vmem:[%s4640_s3 + $0x1f0] sm:$0xff] }
  0x23   :  { %2895 = vmatmul.mubr.f32.vlgmr.msra.gmra.mrb[0].mxu0 %v45_v3  ;;  %v3018_v38 = vpack.c.bf16 %v296_v36, %v294_v35  ;;  %v295_v40 = vld [vmem:[%s4640_s3 + $0x220] sm:$0xff]  ;;  %v298_v41 = vld [vmem:[%s4640_s3 + $0x258] sm:$0xff]  ;;  %v300_v42 = vld [vmem:[%s4640_s3 + $0x288] sm:$0xff] }
  0x24   :  { %3001 = vmatpush1.bf16.msra.mxu0 %v3000_v13  ;;  %381 = vmatprep.mubr.f32.mxu0 %v3414_v6  ;;  %v3020_v43 = vpack.c.bf16 %v295_v40, %v293_v39  ;;  %v3022_v44 = vpack.c.bf16 %v300_v42, %v298_v41  ;;  %v297_v45 = vld [vmem:[%s4640_s3 + $0x250] sm:$0xff]  ;;  %v299_v46 = vld [vmem:[%s4640_s3 + $0x280] sm:$0xff]  ;;  %v169_v48 = vld [vmem:[%s4640_s3 + $0x2a8] sm:$0xff] }
  0x25   :  { %3003 = vmatprep.subr.bf16.mxu0 %v3002_v14  ;;  %v3024_v47 = vpack.c.bf16 %v299_v46, %v297_v45  ;;  %v171_v49 = vld [vmem:[%s4640_s3 + $0x2d8] sm:$0xff]  ;;  %v168_v51 = vld [vmem:[%s4640_s3 + $0x2a0] sm:$0xff]  ;;  %v170_v52 = vld [vmem:[%s4640_s3 + $0x2d0] sm:$0xff] }
  0x26   :  { %v2994_v50 = vpack.c.bf16 %v171_v49, %v169_v48  ;;  %v302_v53 = vld [vmem:[%s4640_s3 + $0x2b8] sm:$0xff]  ;;  %v2996_v54 = vpack.c.bf16 %v170_v52, %v168_v51  ;;  %v304_v55 = vld [vmem:[%s4640_s3 + $0x2e8] sm:$0xff]  ;;  %v301_v56 = vld [vmem:[%s4640_s3 + $0x2b0] sm:$0xff] }
  0x27   :  { %v303_v57 = vld [vmem:[%s4640_s3 + $0x2e0] sm:$0xff]  ;;  %v3026_v58 = vpack.c.bf16 %v304_v55, %v302_v53  ;;  %v406_v60 = vld [vmem:[%s4640_s3 + $0x28] sm:$0xff]  ;;  %v408_v61 = vld [vmem:[%s4640_s3 + $0x58] sm:$0xff] }
  0x28   :  { %3005 = vmatpush1.bf16.msra.mxu0 %v3004_v19  ;;  %2995 = vmatprep.subr.bf16.mxu1 %v2994_v50  ;;  %v3028_v59 = vpack.c.bf16 %v303_v57, %v301_v56  ;;  %v3030_v62 = vpack.c.bf16 %v408_v61, %v406_v60  ;;  %v2441_v63 = vld [vmem:[%s4639_s2] ss:$0 sm:$0xff]  ;;  %v407_v1 = vld [vmem:[%s4640_s3 + $0x50] sm:$0xff]  ;;  %v410_v4 = vld [vmem:[%s4640_s3 + $0x88] sm:$0xff] }
  0x29   :  { %3007 = vmatprep.subr.bf16.mxu0 %v3006_v20  ;;  %2997 = vmatpush1.bf16.msra.mxu1 %v2996_v54  ;;  %v405_v0 = vld [vmem:[%s4640_s3 + $0x20] sm:$0xff]  ;;  %v412_v5 = vld [vmem:[%s4640_s3 + $0xb8] sm:$0xff]  ;;  %v411_v3 = vld [vmem:[%s4640_s3 + $0xb0] sm:$0xff] }
  0x2a   :  { %3031 = vmatprep.subr.bf16.mxu1 %v3030_v62  ;;  %v3032_v9 = vpack.c.bf16 %v407_v1, %v405_v0  ;;  %v3034_v11 = vpack.c.bf16 %v412_v5, %v410_v4  ;;  %v409_v12 = vld [vmem:[%s4640_s3 + $0x80] sm:$0xff]  ;;  %v414_v13 = vld [vmem:[%s4640_s3 + $0xe8] sm:$0xff]  ;;  %v416_v14 = vld [vmem:[%s4640_s3 + $0x118] sm:$0xff]  ;;  %v174_v5 = vlaneseq }
  0x2b   :  { %v3036_v15 = vpack.c.bf16 %v411_v3, %v409_v12  ;;  %v3038_v16 = vpack.c.bf16 %v416_v14, %v414_v13  ;;  %v413_v17 = vld [vmem:[%s4640_s3 + $0xe0] sm:$0xff]  ;;  %v415_v18 = vld [vmem:[%s4640_s3 + $0x110] sm:$0xff]  ;;  %v418_v19 = vld [vmem:[%s4640_s3 + $0x148] sm:$0xff] }
  0x2c   :  { %3009 = vmatpush1.bf16.msra.mxu0 %v3008_v25  ;;  %v420_v20 = vld [vmem:[%s4640_s3 + $0x178] sm:$0xff]  ;;  %v3040_v21 = vpack.c.bf16 %v415_v18, %v413_v17  ;;  %v417_v23 = vld [vmem:[%s4640_s3 + $0x140] sm:$0xff]  ;;  %v419_v24 = vld [vmem:[%s4640_s3 + $0x170] sm:$0xff] }
  0x2d   :  { %3011 = vmatprep.subr.bf16.mxu0 %v3010_v26  ;;  %v3042_v22 = vpack.c.bf16 %v420_v20, %v418_v19  ;;  %v422_v25 = vld [vmem:[%s4640_s3 + $0x1a8] sm:$0xff]  ;;  %v424_v26 = vld [vmem:[%s4640_s3 + $0x1d8] sm:$0xff]  ;;  %v3044_v27 = vpack.c.bf16 %v419_v24, %v417_v23  ;;  %v421_v29 = vld [vmem:[%s4640_s3 + $0x1a0] sm:$0xff] }
  0x2e   :  { %v3046_v28 = vpack.c.bf16 %v424_v26, %v422_v25  ;;  %v423_v30 = vld [vmem:[%s4640_s3 + $0x1d0] sm:$0xff]  ;;  %v425_v35 = vld [vmem:[%s4640_s3 + $0x200] sm:$0xff]  ;;  %v861_v51 = vld [vmem:[%s4643_s6 + $0x88] sm:$0xff] }
  0x2f   :  { %v3048_v33 = vpack.c.bf16 %v423_v30, %v421_v29  ;;  %v427_v36 = vld [vmem:[%s4640_s3 + $0x230] sm:$0xff]  ;;  %v429_v41 = vld [vmem:[%s4640_s3 + $0x260] sm:$0xff]  ;;  %v845_v54 = vld [vmem:[%s4643_s6 + $0x8] sm:$0xff] }
  0x30   :  { %3013 = vmatpush1.bf16.msra.mxu0 %v3012_v31  ;;  %v426_v31 = vld [vmem:[%s4640_s3 + $0x208] sm:$0xff]  ;;  %v3052_v39 = vpack.c.bf16 %v427_v36, %v425_v35  ;;  %v431_v42 = vld [vmem:[%s4640_s3 + $0x290] sm:$0xff]  ;;  %v860_v50 = vld [vmem:[%s4643_s6 + $0x80] sm:$0xff] }
  0x31   :  { %3015 = vmatprep.subr.bf16.mxu0 %v3014_v32  ;;  %v428_v32 = vld [vmem:[%s4640_s3 + $0x238] sm:$0xff]  ;;  %v3056_v45 = vpack.c.bf16 %v431_v42, %v429_v41  ;;  %v435_v48 = vld [vmem:[%s4640_s3 + $0x2f0] sm:$0xff]  ;;  %v844_v52 = vld [vmem:[%s4643_s6] sm:$0xff]  ;;  %v3850_v53 = vpack.c.bf16 %v861_v51, %v860_v50 }
  0x32   :  { %v3050_v34 = vpack.c.bf16 %v428_v32, %v426_v31  ;;  %v862_v55 = vld [vmem:[%s4643_s6 + $0x90] sm:$0xff]  ;;  %v863_v56 = vld [vmem:[%s4643_s6 + $0x98] sm:$0xff]  ;;  %v3861_v57 = vpack.c.bf16 %v845_v54, %v844_v52  ;;  %v864_v61 = vld [vmem:[%s4643_s6 + $0xa0] sm:$0xff] }
  0x33   :  { %v847_v60 = vld [vmem:[%s4643_s6 + $0x18] sm:$0xff]  ;;  %v865_v62 = vld [vmem:[%s4643_s6 + $0xa8] sm:$0xff]  ;;  %v848_v1 = vld [vmem:[%s4643_s6 + $0x20] sm:$0xff] }
  0x34   :  { %3017 = vmatpush1.bf16.msra.mxu0 %v3016_v37  ;;  %v430_v37 = vld [vmem:[%s4640_s3 + $0x268] sm:$0xff]  ;;  %v3882_v0 = vpack.c.bf16 %v865_v62, %v864_v61  ;;  %v866_v35 = vld [vmem:[%s4643_s6 + $0xb0] sm:$0xff]  ;;  %v867_v36 = vld [vmem:[%s4643_s6 + $0xb8] sm:$0xff] }
  0x35   :  { %3019 = vmatprep.subr.bf16.mxu0 %v3018_v38  ;;  %v432_v38 = vld [vmem:[%s4640_s3 + $0x298] sm:$0xff]  ;;  %v868_v41 = vld [vmem:[%s4643_s6 + $0xc0] sm:$0xff]  ;;  %v869_v42 = vld [vmem:[%s4643_s6 + $0xc8] sm:$0xff] }
  0x36   :  { %v3054_v40 = vpack.c.bf16 %v432_v38, %v430_v37  ;;  %v3939_v37 = vpack.c.bf16 %v867_v36, %v866_v35  ;;  %v850_v38 = vld [vmem:[%s4643_s6 + $0x30] sm:$0xff]  ;;  %v855_v54 = vld [vmem:[%s4643_s6 + $0x58] sm:$0xff]  ;;  %v856_v61 = vld [vmem:[%s4643_s6 + $0x60] sm:$0xff] }
  0x37   :  { %v854_v52 = vld [vmem:[%s4643_s6 + $0x50] sm:$0xff] }
  0x38   :  { %3021 = vmatpush1.bf16.msra.mxu0 %v3020_v43  ;;  %v434_v43 = vld [vmem:[%s4640_s3 + $0x2c8] sm:$0xff] }
  0x39   :  { %3023 = vmatprep.subr.bf16.mxu0 %v3022_v44  ;;  %v436_v44 = vld [vmem:[%s4640_s3 + $0x2f8] sm:$0xff] }
  0x3a   :  { %v3058_v46 = vpack.c.bf16 %v436_v44, %v434_v43  ;;  %v3957_v43 = vpack.c.bf16 %v869_v42, %v868_v41  ;;  %v852_v44 = vld [vmem:[%s4643_s6 + $0x40] sm:$0xff] }
  0x3c   :  { %3025 = vmatpush1.bf16.msra.mxu0 %v3024_v47  ;;  %v433_v47 = vld [vmem:[%s4640_s3 + $0x2c0] sm:$0xff] }
  0x3d   :  { %3027 = vmatprep.subr.bf16.mxu0 %v3026_v58  ;;  %v3060_v49 = vpack.c.bf16 %v435_v48, %v433_v47  ;;  %v3863_v58 = vpack.c.bf16 %v863_v56, %v862_v55  ;;  %v870_v48 = vld [vmem:[%s4643_s6 + $0xd0] sm:$0xff]  ;;  %v3988_v56 = vpack.c.bf16 %v855_v54, %v854_v52 }
  0x40   :  { %3029 = vmatpush1.bf16.msra.mxu0 %v3028_v59  ;;  %v846_v59 = vld [vmem:[%s4643_s6 + $0x10] sm:$0xff] }
  0xf6   :  { %v135_v2 = vpop.f32.mrb[0].mxu0 }
  0xf7   :  { %v136_v7 = vadd.f32 %v2441_v63, %v135_v2  ;;  %v2896_v8 = vpop.f32.mrb[1].mxu0  ;;  %v3879_v63 = vpack.c.bf16 %v847_v60, %v846_v59  ;;  %v849_v2 = vld [vmem:[%s4643_s6 + $0x28] sm:$0xff]  ;;  %v872_v59 = vld [vmem:[%s4643_s6 + $0xe0] sm:$0xff] }
  0xf8   :  { %v3891_v4 = vpack.c.bf16 %v849_v2, %v848_v1  ;;  %v873_v60 = vld [vmem:[%s4643_s6 + $0xe8] sm:$0xff]  ;;  %v874_v2 = vld [vmem:[%s4643_s6 + $0xf0] sm:$0xff] }
  0xf9   :  { %v139_v10 = vmax.f32 %v136_v7, 0.0  ;;  %v175_v7 = vshrl.u32 %v174_v5, 7  ;;  %v4000_v62 = vpack.c.bf16 %v873_v60, %v872_v59  ;;  %v857_v1 = vld [vmem:[%s4643_s6 + $0x68] sm:$0xff]  ;;  %v875_v5 = vld [vmem:[%s4643_s6 + $0xf8] sm:$0xff]  ;;  %v1387_v59 = vld [vmem:[%s4644_s7 + $0x80] sm:$0xff] }
  0xfa   :  { %v1388_v60 = vld [vmem:[%s4644_s7 + $0x88] sm:$0xff] }
  0xfb   :  { %249 = vmatmul.mubr.f32.vlgmr.msra.gmra.mrb[0].mxu1 %v139_v10  ;;  %382 = vmatmul.mubr.f32.vlgmr.msra.gmra.mrb[2].mxu0 %v139_v10  ;;  %v3895_v8 = vsub.s32 0, %v175_v7 }
  0xfc   :  { %3033 = vmatpush1.bf16.msra.mxu1 %v3032_v9  ;;  %513 = vmatprep.mubr.f32.mxu1 %v3414_v6  ;;  %v172_v9 = vld [vmem:[%s4641_s4] sm:$0x3] }
  0xfd   :  { %3035 = vmatprep.subr.bf16.mxu1 %v3034_v11  ;;  %619 = vmatprep.mubr.f32.mxu0 %v3414_v6  ;;  %v3903_v11 = vsub.s32 1, %v175_v7  ;;  %v177_v12 = vrot.slane %v172_v9, %v3895_v8 }
  0xff   :  { %v181_v13 = vrot.slane %v172_v9, %v3903_v11 }
 0x100   :  { %3037 = vmatpush1.bf16.msra.mxu1 %v3036_v15 }
 0x101   :  { %3039 = vmatprep.subr.bf16.mxu1 %v3038_v16 }
 0x104   :  { %3041 = vmatpush1.bf16.msra.mxu1 %v3040_v21 }
 0x105   :  { %3043 = vmatprep.subr.bf16.mxu1 %v3042_v22 }
 0x108   :  { %3045 = vmatpush1.bf16.msra.mxu1 %v3044_v27 }
 0x109   :  { %3047 = vmatprep.subr.bf16.mxu1 %v3046_v28 }
 0x10c   :  { %3049 = vmatpush1.bf16.msra.mxu1 %v3048_v33 }
 0x10d   :  { %3051 = vmatprep.subr.bf16.mxu1 %v3050_v34 }
 0x110   :  { %3053 = vmatpush1.bf16.msra.mxu1 %v3052_v39  ;;  %v851_v39 = vld [vmem:[%s4643_s6 + $0x38] sm:$0xff] }
 0x111   :  { %3055 = vmatprep.subr.bf16.mxu1 %v3054_v40  ;;  %v3947_v40 = vpack.c.bf16 %v851_v39, %v850_v38 }
 0x114   :  { %3057 = vmatpush1.bf16.msra.mxu1 %v3056_v45  ;;  %v853_v45 = vld [vmem:[%s4643_s6 + $0x48] sm:$0xff] }
 0x115   :  { %3059 = vmatprep.subr.bf16.mxu1 %v3058_v46  ;;  %v437_v46 = vld [vmem:[%s4641_s4 + $0x4] sm:$0x3]  ;;  %v3968_v47 = vpack.c.bf16 %v853_v45, %v852_v44 }
 0x116   :  { %v442_v50 = vrot.slane %v437_v46, %v3895_v8  ;;  %v446_v55 = vrot.slane %v437_v46, %v3903_v11 }
 0x118   :  { %3061 = vmatpush1.bf16.msra.mxu1 %v3060_v49  ;;  %v871_v49 = vld [vmem:[%s4643_s6 + $0xd8] sm:$0xff] }
 0x119   :  { %3063 = vmatprep.subr.bf16.mxu1 %v3850_v53  ;;  %v3979_v51 = vpack.c.bf16 %v871_v49, %v870_v48  ;;  %v538_v49 = vld [vmem:[%s4642_s5 + $0x8] sm:$0xff] }
 0x11b   :  { %514 = vmatmul.mubr.f32.vlgmr.msra.gmra.mrb[2].mxu1 %v139_v10  ;;  %v305_v10 = vld [vmem:[%s4641_s4 + $0x2] sm:$0x3]  ;;  %s3392_s4 = scalar_lea.vmem %s2434_s21, 32 }
 0x11c   :  { %3065 = vmatpush3.bf16.msra.mxu1 %v3861_v57  ;;  %v310_v3 = vrot.slane %v305_v10, %v3895_v8  ;;  %v314_v14 = vrot.slane %v305_v10, %v3903_v11  ;;  %v4012_v8 = vpack.c.bf16 %v857_v1, %v856_v61  ;;  %v4017_v11 = vpack.c.bf16 %v875_v5, %v874_v2  ;;  %v2452_v2 = vld [vmem:[%s4642_s5 + $0x20] sm:$0xff] }
 0x11d   :  { %3067 = vmatprep.subr.bf16.mxu1 %v3863_v58  ;;  %v4115_v5 = vpack.c.bf16 %v1388_v60, %v1387_v59  ;;  %v1900_v60 = vld [vmem:[%s4645_s8 + $0x10] sm:$0xff] }
 0x120   :  { %3069 = vmatpush3.bf16.msra.mxu1 %v3879_v63 }
 0x121   :  { %3071 = vmatprep.subr.bf16.mxu1 %v3882_v0 }
 0x124   :  { %3073 = vmatpush3.bf16.msra.mxu1 %v3891_v4 }
 0x125   :  { %3075 = vmatprep.subr.bf16.mxu1 %v3939_v37 }
 0x128   :  { %3077 = vmatpush3.bf16.msra.mxu1 %v3947_v40 }
 0x129   :  { %3079 = vmatprep.subr.bf16.mxu1 %v3957_v43 }
 0x12c   :  { %3081 = vmatpush3.bf16.msra.mxu1 %v3968_v47 }
 0x12d   :  { %3083 = vmatprep.subr.bf16.mxu1 %v3979_v51 }
 0x130   :  { %3085 = vmatpush3.bf16.msra.mxu1 %v3988_v56 }
 0x131   :  { %3087 = vmatprep.subr.bf16.mxu1 %v4000_v62 }
 0x134   :  { %3089 = vmatpush3.bf16.msra.mxu1 %v4012_v8 }
 0x135   :  { %3091 = vmatprep.subr.bf16.mxu1 %v4017_v11 }
 0x1ce   :  { %v250_v15 = vpop.f32.mrb[0].mxu1  ;;  %v383_v16 = vpop.f32.mrb[2].mxu0 }
 0x1cf   :  { %v3909_v17 = vadd.f32 %v250_v15, %v177_v12  ;;  %v3911_v18 = vadd.f32 %v383_v16, %v310_v3  ;;  %v252_v19 = vpop.f32.mrb[1].mxu1  ;;  %v385_v20 = vpop.f32.mrb[3].mxu0  ;;  %v858_v12 = vld [vmem:[%s4643_s6 + $0x70] sm:$0xff]  ;;  %v859_v3 = vld [vmem:[%s4643_s6 + $0x78] sm:$0xff] }
 0x1d0   :  { %v3913_v21 = vadd.f32 %v252_v19, %v181_v13  ;;  %v3915_v22 = vadd.f32 %v385_v20, %v314_v14  ;;  %v4036_v20 = vpack.c.bf16 %v859_v3, %v858_v12  ;;  %v1390_v12 = vld [vmem:[%s4644_s7 + $0x98] sm:$0xff]  ;;  %v2453_v3 = vld [vmem:[%s4642_s5 + $0x28] sm:$0xff] }
 0x1d1   :  { %v256_v23 = vsel %vm255_vm1, %v3909_v17, inf  ;;  %v388_v24 = vsel %vm255_vm1, %v3911_v18, inf  ;;  %v261_v29 = vsel %vm255_vm1, %v3909_v17, -inf  ;;  %v393_v31 = vsel %vm255_vm1, %v3911_v18, -inf }
 0x1d2   :  { %v257_v25 = vsel %vm255_vm1, %v3913_v21, inf  ;;  %v389_v26 = vsel %vm255_vm1, %v3915_v22, inf  ;;  %v262_v30 = vsel %vm255_vm1, %v3913_v21, -inf  ;;  %v394_v32 = vsel %vm255_vm1, %v3915_v22, -inf  ;;  %3093 = vmatpush3.bf16.msra.mxu1 %v4036_v20 }
 0x1d3   :  { %v258_v27 = vmin.f32 %v256_v23, %v257_v25  ;;  %v390_v28 = vmin.f32 %v388_v24, %v389_v26  ;;  %v263_v33 = vmax.f32 %v261_v29, %v262_v30  ;;  %v395_v34 = vmax.f32 %v393_v31, %v394_v32  ;;  %3127 = vmatprep.subr.bf16.mxu1 %v3850_v53 }
 0x1d5   :  { %259 = vmin.xlane.f32.xlu1 %v258_v27  ;;  %391 = vmin.xlane.f32.xlu0 %v390_v28 }
 0x1d9   :  { %264 = vmax.xlane.f32.xlu1 %v263_v33  ;;  %396 = vmax.xlane.f32.xlu0 %v395_v34 }
 0x1ee   :  { %v515_v7 = vpop.f32.mrb[2].mxu1 }
 0x1ef   :  { %v4014_v9 = vadd.f32 %v515_v7, %v442_v50  ;;  %v517_v10 = vpop.f32.mrb[3].mxu1  ;;  %v1371_v7 = vld [vmem:[%s4644_s7] sm:$0xff] }
 0x1f0   :  { %v4025_v13 = vadd.f32 %v517_v10, %v446_v55  ;;  %v1389_v10 = vld [vmem:[%s4644_s7 + $0x90] sm:$0xff] }
 0x1f1   :  { %v525_v14 = vsel %vm255_vm1, %v4014_v9, -inf  ;;  %v520_v15 = vsel %vm255_vm1, %v4014_v9, inf }
 0x1f2   :  { %v526_v16 = vsel %vm255_vm1, %v4025_v13, -inf  ;;  %v521_v19 = vsel %vm255_vm1, %v4025_v13, inf }
 0x1f3   :  { %v527_v23 = vmax.f32 %v525_v14, %v526_v16  ;;  %v522_v24 = vmin.f32 %v520_v15, %v521_v19  ;;  %v1374_v14 = vld [vmem:[%s4644_s7 + $0x18] sm:$0xff]  ;;  %v1391_v15 = vld [vmem:[%s4644_s7 + $0xa0] sm:$0xff] }
 0x1f4   :  { %v1375_v19 = vld [vmem:[%s4644_s7 + $0x20] sm:$0xff] }
 0x1f5   :  { %528 = vmax.xlane.f32.xlu1 %v527_v23  ;;  %523 = vmin.xlane.f32.xlu0 %v522_v24  ;;  %v1376_v23 = vld [vmem:[%s4644_s7 + $0x28] sm:$0xff]  ;;  %v1394_v24 = vld [vmem:[%s4644_s7 + $0xb8] sm:$0xff] }
 0x262   :  { %v260_v25 = vpop.xlane.xlu1 %259  ;;  %v392_v26 = vpop.xlane.xlu0 %391 }
 0x263   :  { %v266_v33 = vsub.f32 %v3909_v17, %v260_v25  ;;  %v267_v34 = vsub.f32 %v3913_v21, %v260_v25  ;;  %v398_v36 = vsub.f32 %v3911_v18, %v392_v26  ;;  %v399_v38 = vsub.f32 %v3915_v22, %v392_v26  ;;  %v2442_v17 = vld [vmem:[%s4642_s5 + $0x10] sm:$0xff]  ;;  %v2443_v18 = vld [vmem:[%s4642_s5 + $0x18] sm:$0xff]  ;;  %v537_v21 = vld [vmem:[%s4642_s5] sm:$0xff] }
 0x266   :  { %v265_v27 = vpop.xlane.xlu1 %264  ;;  %v397_v28 = vpop.xlane.xlu0 %396 }
 0x267   :  { %v268_v29 = vsub.f32 %v265_v27, %v260_v25  ;;  %v400_v30 = vsub.f32 %v397_v28, %v392_v26  ;;  %v4182_v25 = vpack.c.bf16 %v1376_v23, %v1375_v19  ;;  %v1378_v27 = vld [vmem:[%s4644_s7 + $0x38] sm:$0xff]  ;;  %v1395_v28 = vld [vmem:[%s4644_s7 + $0xc0] sm:$0xff]  ;;  %v1904_v23 = vld [vmem:[%s4645_s8 + $0x30] sm:$0xff] }
 0x269   :  { %v269_v31 = vadd.f32 1e-05, %v268_v29  ;;  %v401_v32 = vadd.f32 1e-05, %v400_v30 }
 0x26b   :  { %3382 = vrcp.f32 %v269_v31  ;;  %v1380_v31 = vld [vmem:[%s4644_s7 + $0x48] sm:$0xff] }
 0x26c   :  { %3384 = vrcp.f32 %v401_v32  ;;  %v1397_v32 = vld [vmem:[%s4644_s7 + $0xd0] sm:$0xff] }
 0x275   :  { %v3383_v35 = vpop.eup %3382 }
 0x276   :  { %v3385_v39 = vpop.eup %3384  ;;  %v4045_v41 = vmul.f32 %v3383_v35, %v267_v34  ;;  %v4047_v42 = vmul.f32 %v3383_v35, %v266_v33  ;;  %v1382_v35 = vld [vmem:[%s4644_s7 + $0x58] sm:$0xff] }
 0x277   :  { %v4049_v44 = vmul.f32 %v3385_v39, %v399_v38  ;;  %v4051_v45 = vmul.f32 %v3385_v39, %v398_v36  ;;  %v1399_v36 = vld [vmem:[%s4644_s7 + $0xe0] sm:$0xff] }
 0x278   :  { %940 = vmatprep.mubr.f32.mxu1 %v4045_v41 }
 0x279   :  { %2444 = vmatprep.subr.msk.mxu0 %vm255_vm1, %v4049_v44  ;;  %941 = vmatmul.mubr.f32.vlgmr.msra.gmra.mrb[4].mxu1 %v4047_v42 }
 0x27a   :  { %2445 = vmatpush1.msk.msra.mxu0 %vm255_vm1, %v4051_v45  ;;  %3129 = vmatpush3.bf16.msra.mxu1 %v3861_v57 }
 0x27b   :  { %2448 = vmatprep.subr.msk.mxu0 %vm255_vm1, %v4045_v41  ;;  %2446 = vmatmul.mubr.msk.f32.vlgmr.msra.gmra.mrb[4].mxu0 %vm542_vm2, %v2442_v17  ;;  %v1384_v17 = vld [vmem:[%s4644_s7 + $0x68] sm:$0xff] }
 0x27c   :  { %2449 = vmatpush1.msk.msra.mxu0 %vm255_vm1, %v4047_v42  ;;  %3131 = vmatprep.subr.bf16.mxu1 %v3863_v58 }
 0x27d   :  { %625 = vmatprep.mubr.f32.mxu0 %v3414_v6 }
 0x27e   :  { %3133 = vmatpush3.bf16.msra.mxu1 %v3879_v63 }
 0x27f   :  { %3135 = vmatprep.subr.bf16.mxu1 %v3882_v0  ;;  %2447 = vmatmul.mubr.msk.f32.gmra.mrb[6].mxu0 %vm542_vm2, %v2443_v18  ;;  %v1401_v18 = vld [vmem:[%s4644_s7 + $0xf0] sm:$0xff] }
 0x280   :  { %708 = vmatprep.mubr.f32.mxu0 %v3414_v6 }
 0x282   :  { %3137 = vmatpush3.bf16.msra.mxu1 %v3891_v4  ;;  %v529_v22 = vpop.xlane.xlu1 %528  ;;  %v524_v46 = vpop.xlane.xlu0 %523 }
 0x283   :  { %v532_v48 = vsub.f32 %v529_v22, %v524_v46  ;;  %3139 = vmatprep.subr.bf16.mxu1 %v3939_v37  ;;  %2450 = vmatmul.mubr.msk.f32.vlgmr.msra.gmra.mrb[4].mxu0 %vm542_vm2, %v537_v21  ;;  %v530_v52 = vsub.f32 %v4014_v9, %v524_v46  ;;  %v531_v54 = vsub.f32 %v4025_v13, %v524_v46  ;;  %v1372_v9 = vld [vmem:[%s4644_s7 + $0x8] sm:$0xff]  ;;  %v1386_v46 = vld [vmem:[%s4644_s7 + $0x78] sm:$0xff] }
 0x284   :  { %714 = vmatprep.mubr.f32.mxu0 %v3414_v6  ;;  %v4138_v13 = vpack.c.bf16 %v1372_v9, %v1371_v7  ;;  %v1918_v7 = vld [vmem:[%s4645_s8 + $0xa0] sm:$0xff]  ;;  %v1919_v9 = vld [vmem:[%s4645_s8 + $0xa8] sm:$0xff] }
 0x285   :  { %v533_v50 = vadd.f32 1e-05, %v532_v48  ;;  %v1914_v48 = vld [vmem:[%s4645_s8 + $0x80] sm:$0xff] }
 0x286   :  { %3141 = vmatpush3.bf16.msra.mxu1 %v3947_v40 }
 0x287   :  { %3386 = vrcp.f32 %v533_v50  ;;  %3143 = vmatprep.subr.bf16.mxu1 %v3957_v43  ;;  %2451 = vmatmul.mubr.msk.f32.gmra.mrb[6].mxu0 %vm542_vm2, %v538_v49 }
 0x288   :  { %800 = vmatprep.mubr.f32.mxu0 %v3414_v6 }
 0x28a   :  { %3145 = vmatpush3.bf16.msra.mxu1 %v3968_v47 }
 0x28b   :  { %3147 = vmatprep.subr.bf16.mxu1 %v3979_v51 }
 0x28e   :  { %3149 = vmatpush3.bf16.msra.mxu1 %v3988_v56 }
 0x28f   :  { %3151 = vmatprep.subr.bf16.mxu1 %v4000_v62 }
 0x291   :  { %v3387_v55 = vpop.eup %3386 }
 0x292   :  { %v4103_v61 = vmul.f32 %v3387_v55, %v530_v52  ;;  %v4105_v1 = vmul.f32 %v3387_v55, %v531_v54  ;;  %3153 = vmatpush3.bf16.msra.mxu1 %v4012_v8  ;;  %v1899_v52 = vld [vmem:[%s4645_s8 + $0x8] sm:$0xff]  ;;  %v1916_v54 = vld [vmem:[%s4645_s8 + $0x90] sm:$0xff] }
 0x293   :  { %3155 = vmatprep.subr.bf16.mxu1 %v4017_v11 }
 0x294   :  { %2454 = vmatprep.subr.msk.mxu0 %vm255_vm1, %v4105_v1  ;;  %1254 = vmatprep.mubr.f32.mxu1 %v4105_v1 }
 0x295   :  { %2455 = vmatpush1.msk.msra.mxu0 %vm255_vm1, %v4103_v61 }
 0x296   :  { %2456 = vmatmul.mubr.msk.f32.vlgmr.msra.gmra.mrb[4].mxu0 %vm542_vm2, %v2452_v2  ;;  %3095 = vmatprep.subr.bf16.mxu0 %v3850_v53  ;;  %v1373_v53 = vld [vmem:[%s4644_s7 + $0x10] sm:$0xff]  ;;  %v1901_v2 = vld [vmem:[%s4645_s8 + $0x18] sm:$0xff] }
 0x297   :  { %3157 = vmatpush3.bf16.msra.mxu1 %v4036_v20  ;;  %3097 = vmatpush3.bf16.msra.mxu0 %v3861_v57  ;;  %v4149_v57 = vpack.c.bf16 %v1390_v12, %v1389_v10  ;;  %v4161_v16 = vpack.c.bf16 %v1374_v14, %v1373_v53  ;;  %v4322_v10 = vpack.c.bf16 %v1901_v2, %v1900_v60  ;;  %v1903_v53 = vld [vmem:[%s4645_s8 + $0x28] sm:$0xff]  ;;  %v1920_v14 = vld [vmem:[%s4645_s8 + $0xb0] sm:$0xff]  ;;  %v2460_v60 = vld [vmem:[%s4642_s5 + $0x40] sm:$0xff] }
 0x298   :  { %806 = vmatprep.mubr.f32.mxu0 %v3414_v6  ;;  %3191 = vmatprep.subr.bf16.mxu1 %v4115_v5  ;;  %v1392_v6 = vld [vmem:[%s4644_s7 + $0xa8] sm:$0xff]  ;;  %v4325_v12 = vpack.c.bf16 %v1919_v9, %v1918_v7 }
 0x299   :  { %3099 = vmatprep.subr.bf16.mxu0 %v3863_v58  ;;  %v4165_v58 = vpack.c.bf16 %v1392_v6, %v1391_v15  ;;  %v1921_v15 = vld [vmem:[%s4645_s8 + $0xb8] sm:$0xff] }
 0x29a   :  { %1255 = vmatmul.mubr.f32.vlgmr.msra.gmra.mrb[6].mxu1 %v4103_v61  ;;  %2457 = vmatmul.mubr.msk.f32.gmra.mrb[6].mxu0 %vm542_vm2, %v2453_v3  ;;  %v1902_v3 = vld [vmem:[%s4645_s8 + $0x20] sm:$0xff]  ;;  %v4343_v19 = vpack.c.bf16 %v1921_v15, %v1920_v14 }
 0x29b   :  { %3193 = vmatpush3.bf16.msra.mxu1 %v4138_v13  ;;  %1540 = vmatprep.mubr.f32.mxu1 %v4049_v44  ;;  %v4340_v6 = vpack.c.bf16 %v1903_v53, %v1902_v3  ;;  %v817_v3 = vld [vmem:[%s4646_s9] sm:$0xff]  ;;  %v818_v53 = vld [vmem:[%s4646_s9 + $0x8] sm:$0xff] }
 0x29c   :  { %3101 = vmatpush3.bf16.msra.mxu0 %v3879_v63  ;;  %1013 = vmatprep.mubr.f32.mxu0 %v4049_v44  ;;  %v1393_v63 = vld [vmem:[%s4644_s7 + $0xb0] sm:$0xff] }
 0x29d   :  { %3195 = vmatprep.subr.bf16.mxu1 %v4149_v57  ;;  %3103 = vmatprep.subr.bf16.mxu0 %v3882_v0  ;;  %v4186_v26 = vpack.c.bf16 %v1394_v24, %v1393_v63  ;;  %v1377_v0 = vld [vmem:[%s4644_s7 + $0x30] sm:$0xff]  ;;  %v1905_v63 = vld [vmem:[%s4645_s8 + $0x38] sm:$0xff]  ;;  %v1922_v24 = vld [vmem:[%s4645_s8 + $0xc0] sm:$0xff] }
 0x29e   :  { %v4202_v29 = vpack.c.bf16 %v1378_v27, %v1377_v0  ;;  %v1923_v0 = vld [vmem:[%s4645_s8 + $0xc8] sm:$0xff]  ;;  %v4358_v27 = vpack.c.bf16 %v1905_v63, %v1904_v23 }
 0x29f   :  { %3197 = vmatpush3.bf16.msra.mxu1 %v4161_v16 }
 0x2a0   :  { %3105 = vmatpush3.bf16.msra.mxu0 %v3891_v4  ;;  %3199 = vmatprep.subr.bf16.mxu1 %v4165_v58  ;;  %v1396_v4 = vld [vmem:[%s4644_s7 + $0xc8] sm:$0xff] }
 0x2a1   :  { %3107 = vmatprep.subr.bf16.mxu0 %v3939_v37  ;;  %v4206_v30 = vpack.c.bf16 %v1396_v4, %v1395_v28  ;;  %v1379_v37 = vld [vmem:[%s4644_s7 + $0x40] sm:$0xff]  ;;  %v4361_v28 = vpack.c.bf16 %v1923_v0, %v1922_v24  ;;  %v819_v24 = vld [vmem:[%s4646_s9 + $0x10] sm:$0xff] }
 0x2a2   :  { %v4222_v33 = vpack.c.bf16 %v1380_v31, %v1379_v37  ;;  %v1906_v4 = vld [vmem:[%s4645_s8 + $0x40] sm:$0xff]  ;;  %v1907_v37 = vld [vmem:[%s4645_s8 + $0x48] sm:$0xff]  ;;  %v1924_v31 = vld [vmem:[%s4645_s8 + $0xd0] sm:$0xff] }
 0x2a3   :  { %3201 = vmatpush3.bf16.msra.mxu1 %v4182_v25 }
 0x2a4   :  { %3109 = vmatpush3.bf16.msra.mxu0 %v3947_v40  ;;  %3203 = vmatprep.subr.bf16.mxu1 %v4186_v26  ;;  %v1398_v40 = vld [vmem:[%s4644_s7 + $0xd8] sm:$0xff] }
 0x2a5   :  { %3111 = vmatprep.subr.bf16.mxu0 %v3957_v43  ;;  %v4226_v34 = vpack.c.bf16 %v1398_v40, %v1397_v32  ;;  %v1381_v43 = vld [vmem:[%s4644_s7 + $0x50] sm:$0xff]  ;;  %v1925_v32 = vld [vmem:[%s4645_s8 + $0xd8] sm:$0xff]  ;;  %v4376_v40 = vpack.c.bf16 %v1907_v37, %v1906_v4 }
 0x2a6   :  { %v4242_v38 = vpack.c.bf16 %v1382_v35, %v1381_v43  ;;  %v4379_v43 = vpack.c.bf16 %v1925_v32, %v1924_v31  ;;  %v1908_v35 = vld [vmem:[%s4645_s8 + $0x50] sm:$0xff]  ;;  %v820_v4 = vld [vmem:[%s4646_s9 + $0x18] sm:$0xff] }
 0x2a7   :  { %3205 = vmatpush3.bf16.msra.mxu1 %v4202_v29 }
 0x2a8   :  { %3113 = vmatpush3.bf16.msra.mxu0 %v3968_v47  ;;  %3207 = vmatprep.subr.bf16.mxu1 %v4206_v30  ;;  %v1400_v47 = vld [vmem:[%s4644_s7 + $0xe8] sm:$0xff] }
 0x2a9   :  { %3115 = vmatprep.subr.bf16.mxu0 %v3979_v51  ;;  %v4246_v39 = vpack.c.bf16 %v1400_v47, %v1399_v36  ;;  %v1383_v51 = vld [vmem:[%s4644_s7 + $0x60] sm:$0xff]  ;;  %v1909_v36 = vld [vmem:[%s4645_s8 + $0x58] sm:$0xff] }
 0x2aa   :  { %v4262_v21 = vpack.c.bf16 %v1384_v17, %v1383_v51  ;;  %v1926_v47 = vld [vmem:[%s4645_s8 + $0xe0] sm:$0xff]  ;;  %v1927_v51 = vld [vmem:[%s4645_s8 + $0xe8] sm:$0xff]  ;;  %v4394_v17 = vpack.c.bf16 %v1909_v36, %v1908_v35 }
 0x2ab   :  { %3209 = vmatpush3.bf16.msra.mxu1 %v4222_v33 }
 0x2ac   :  { %3117 = vmatpush3.bf16.msra.mxu0 %v3988_v56  ;;  %3211 = vmatprep.subr.bf16.mxu1 %v4226_v34  ;;  %v1402_v56 = vld [vmem:[%s4644_s7 + $0xf8] sm:$0xff] }
 0x2ad   :  { %3119 = vmatprep.subr.bf16.mxu0 %v4000_v62  ;;  %v4266_v22 = vpack.c.bf16 %v1402_v56, %v1401_v18  ;;  %v1385_v62 = vld [vmem:[%s4644_s7 + $0x70] sm:$0xff]  ;;  %v4397_v18 = vpack.c.bf16 %v1927_v51, %v1926_v47  ;;  %v1910_v56 = vld [vmem:[%s4645_s8 + $0x60] sm:$0xff] }
 0x2ae   :  { %v4282_v49 = vpack.c.bf16 %v1386_v46, %v1385_v62  ;;  %v1911_v62 = vld [vmem:[%s4645_s8 + $0x68] sm:$0xff]  ;;  %v1928_v46 = vld [vmem:[%s4645_s8 + $0xf0] sm:$0xff] }
 0x2af   :  { %3213 = vmatpush3.bf16.msra.mxu1 %v4242_v38 }
 0x2b0   :  { %3121 = vmatpush3.bf16.msra.mxu0 %v4012_v8  ;;  %3215 = vmatprep.subr.bf16.mxu1 %v4246_v39  ;;  %v1915_v8 = vld [vmem:[%s4645_s8 + $0x88] sm:$0xff] }
 0x2b1   :  { %3123 = vmatprep.subr.bf16.mxu0 %v4017_v11  ;;  %v4286_v50 = vpack.c.bf16 %v1915_v8, %v1914_v48  ;;  %v1898_v11 = vld [vmem:[%s4645_s8] sm:$0xff]  ;;  %v1929_v48 = vld [vmem:[%s4645_s8 + $0xf8] sm:$0xff]  ;;  %v4412_v8 = vpack.c.bf16 %v1911_v62, %v1910_v56 }
 0x2b2   :  { %v4302_v55 = vpack.c.bf16 %v1899_v52, %v1898_v11  ;;  %v4415_v11 = vpack.c.bf16 %v1929_v48, %v1928_v46  ;;  %v1912_v52 = vld [vmem:[%s4645_s8 + $0x70] sm:$0xff] }
 0x2b3   :  { %3217 = vmatpush3.bf16.msra.mxu1 %v4262_v21 }
 0x2b4   :  { %3125 = vmatpush3.bf16.msra.mxu0 %v4036_v20  ;;  %3219 = vmatprep.subr.bf16.mxu1 %v4266_v22  ;;  %v1917_v20 = vld [vmem:[%s4645_s8 + $0x98] sm:$0xff] }
 0x2b5   :  { %v4305_v59 = vpack.c.bf16 %v1917_v20, %v1916_v54  ;;  %v1913_v54 = vld [vmem:[%s4645_s8 + $0x78] sm:$0xff] }
 0x2b6   :  { %v4424_v20 = vpack.c.bf16 %v1913_v54, %v1912_v52 }
 0x2b7   :  { %1014 = vmatmul.mubr.f32.vlgmr.msra.gmra.mrb[8].mxu0 %v4051_v45  ;;  %3221 = vmatpush3.bf16.msra.mxu1 %v4282_v49 }
 0x2b8   :  { %3255 = vmatprep.subr.bf16.mxu1 %v4286_v50  ;;  %2899 = vmatprep.mubr.msk.f32.mxu0 %vm542_vm2, %v2460_v60 }
 0x2ba   :  { %1541 = vmatmul.mubr.f32.vlgmr.msra.gmra.mrb[8].mxu1 %v4051_v45 }
 0x2bb   :  { %3257 = vmatpush3.bf16.msra.mxu1 %v4302_v55  ;;  %1994 = vmatprep.mubr.f32.mxu1 %v4045_v41 }
 0x2bc   :  { %3259 = vmatprep.subr.bf16.mxu1 %v4305_v59 }
 0x2bf   :  { %3261 = vmatpush3.bf16.msra.mxu1 %v4322_v10 }
 0x2c0   :  { %3263 = vmatprep.subr.bf16.mxu1 %v4325_v12 }
 0x2c3   :  { %3265 = vmatpush3.bf16.msra.mxu1 %v4340_v6 }
 0x2c4   :  { %3267 = vmatprep.subr.bf16.mxu1 %v4343_v19 }
 0x2c7   :  { %3269 = vmatpush3.bf16.msra.mxu1 %v4358_v27 }
 0x2c8   :  { %3271 = vmatprep.subr.bf16.mxu1 %v4361_v28 }
 0x2cb   :  { %3273 = vmatpush3.bf16.msra.mxu1 %v4376_v40 }
 0x2cc   :  { %3275 = vmatprep.subr.bf16.mxu1 %v4379_v43 }
 0x2cf   :  { %3277 = vmatpush3.bf16.msra.mxu1 %v4394_v17 }
 0x2d0   :  { %3279 = vmatprep.subr.bf16.mxu1 %v4397_v18 }
 0x2d3   :  { %3281 = vmatpush3.bf16.msra.mxu1 %v4412_v8 }
 0x2d4   :  { %3283 = vmatprep.subr.bf16.mxu1 %v4415_v11 }
 0x2d7   :  { %3285 = vmatpush3.bf16.msra.mxu1 %v4424_v20 }
 0x2da   :  { %1995 = vmatmul.mubr.f32.vlgmr.msra.gmra.mrb[10].mxu1 %v4047_v42 }
 0x34c   :  { %v2552_v2 = vpop.f32.mrb[4].mxu1 }
 0x34d   :  { %v2553_v7 = vpop.f32.mrb[5].mxu1 }
 0x34e   :  { %v2554_v9 = vadd.f32 %v2553_v7, %v2552_v2 }
 0x369   :  { %v802_v14 = vpop.f32.mrb[4].mxu0 }
 0x36a   :  { %v821_v15 = vsub.f32 %v802_v14, %v817_v3  ;;  %v804_v23 = vpop.f32.mrb[5].mxu0 }
 0x36b   :  { %v822_v63 = vsub.f32 %v804_v23, %v818_v53  ;;  %v2461_v53 = vld [vmem:[%s4642_s5 + $0x48] sm:$0xff] }
 0x36c   :  { %v825_v0 = vmul.f32 %v821_v15, %v821_v15  ;;  %v2458_v15 = vld [vmem:[%s4642_s5 + $0x30] sm:$0xff] }
 0x36d   :  { %v826_v37 = vmul.f32 %v822_v63, %v822_v63  ;;  %v2628_v31 = vpop.f32.mrb[6].mxu1  ;;  %v808_v32 = vpop.f32.mrb[6].mxu0  ;;  %v2459_v63 = vld [vmem:[%s4642_s5 + $0x38] sm:$0xff] }
 0x36e   :  { %v823_v35 = vsub.f32 %v808_v32, %v819_v24  ;;  %v2629_v36 = vpop.f32.mrb[7].mxu1  ;;  %v810_v47 = vpop.f32.mrb[7].mxu0  ;;  %v2468_v24 = vld [vmem:[%s4642_s5 + $0x50] sm:$0xff] }
 0x36f   :  { %v829_v51 = vadd.f32 %v826_v37, %v825_v0  ;;  %v2630_v56 = vadd.f32 %v2629_v36, %v2628_v31  ;;  %v824_v62 = vsub.f32 %v810_v47, %v820_v4  ;;  %v2476_v31 = vld [vmem:[%s4642_s5 + $0x78] sm:$0xff] }
 0x370   :  { %v827_v46 = vmul.f32 %v823_v35, %v823_v35 }
 0x371   :  { %v828_v48 = vmul.f32 %v824_v62, %v824_v62  ;;  %v2473_v62 = vld [vmem:[%s4642_s5 + $0x60] sm:$0xff] }
 0x372   :  { %v830_v52 = vadd.f32 %v829_v51, %v827_v46  ;;  %v1350_v46 = vld [vmem:[%s4647_s10 + $0x8] sm:$0xff] }
 0x374   :  { %v831_v54 = vadd.f32 %v830_v52, %v828_v48  ;;  %v1349_v48 = vld [vmem:[%s4647_s10] sm:$0xff]  ;;  %s3388_s10 = scalar_lea.vmem %s2434_s21, 16 }
 0x375   :  { %p3389_p0 = scmp.ne.s32.totalorder %s2434_s21, %s3388_s10  ;;  %p3394_p2 = scmp.lt.s32.totalorder %s3392_s4, %s3388_s10 }
 0x376   :  { %832 = vadd.xlane.f32.xlu0 %v831_v54 }
 0x377   :  { %p3395_p3 = por %p3394_p2, %p3393_p1 }
 0x379   :  { %p3396_p4 = pnand %p3395_p3, %p3389_p0 }
 0x38a   :  { %v2587_v60 = vpop.f32.mrb[8].mxu0 }
 0x38b   :  { %v2588_v2 = vpop.f32.mrb[9].mxu0 }
 0x38c   :  { %v2589_v7 = vadd.f32 %v2588_v2, %v2587_v60 }
 0x38d   :  { %v2701_v3 = vpop.f32.mrb[8].mxu1 }
 0x38e   :  { %2897 = vmatprep.subr.msk.mxu0 %vm255_vm1, %v2589_v7  ;;  %v2702_v14 = vpop.f32.mrb[9].mxu1 }
 0x38f   :  { %v2703_v23 = vadd.f32 %v2702_v14, %v2701_v3  ;;  %2898 = vmatpush3.msk.msra.mxu0 %vm255_vm1, %v2589_v7 }
 0x390   :  { %2900 = vmatmul.mubr.msk.f32.vlgmr.msra.gmra.mrb[10].mxu0 %vm542_vm2, %v2461_v53  ;;  %2902 = vmatprep.subr.msk.mxu0 %vm255_vm1, %v2554_v9 }
 0x391   :  { %2903 = vmatpush3.msk.msra.mxu0 %vm255_vm1, %v2554_v9  ;;  %2904 = vmatprep.mubr.msk.f32.mxu0 %vm542_vm2, %v2458_v15  ;;  %v2469_v9 = vld [vmem:[%s4642_s5 + $0x58] sm:$0xff] }
 0x392   :  { %2907 = vmatprep.subr.msk.mxu0 %vm255_vm1, %v2630_v56 }
 0x398   :  { %2905 = vmatmul.mubr.msk.f32.vlgmr.msra.gmra.mrb[10].mxu0 %vm542_vm2, %v2459_v63 }
 0x399   :  { %2908 = vmatpush3.msk.msra.mxu0 %vm255_vm1, %v2630_v56  ;;  %2909 = vmatprep.mubr.msk.f32.mxu0 %vm542_vm2, %v2468_v24 }
 0x39a   :  { %3159 = vmatprep.subr.bf16.mxu0 %v4115_v5 }
 0x3a0   :  { %2910 = vmatmul.mubr.msk.f32.vlgmr.msra.gmra.mrb[10].mxu0 %vm542_vm2, %v2469_v9  ;;  %v2474_v9 = vld [vmem:[%s4642_s5 + $0x68] sm:$0xff] }
 0x3a1   :  { %3161 = vmatpush3.bf16.msra.mxu0 %v4138_v13  ;;  %1467 = vmatprep.mubr.f32.mxu0 %v4045_v41  ;;  %v2475_v41 = vld [vmem:[%s4642_s5 + $0x70] sm:$0xff] }
 0x3a2   :  { %3163 = vmatprep.subr.bf16.mxu0 %v4149_v57 }
 0x3a5   :  { %3165 = vmatpush3.bf16.msra.mxu0 %v4161_v16 }
 0x3a6   :  { %3167 = vmatprep.subr.bf16.mxu0 %v4165_v58 }
 0x3a9   :  { %3169 = vmatpush3.bf16.msra.mxu0 %v4182_v25 }
 0x3aa   :  { %3171 = vmatprep.subr.bf16.mxu0 %v4186_v26 }
 0x3ad   :  { %3173 = vmatpush3.bf16.msra.mxu0 %v4202_v29  ;;  %v2780_v0 = vpop.f32.mrb[10].mxu1 }
 0x3ae   :  { %v2781_v4 = vpop.f32.mrb[11].mxu1  ;;  %3175 = vmatprep.subr.bf16.mxu0 %v4206_v30 }
 0x3af   :  { %v4481_v37 = vadd.f32 %v2781_v4, %v2780_v0 }
 0x3b1   :  { %3177 = vmatpush3.bf16.msra.mxu0 %v4222_v33 }
 0x3b2   :  { %3179 = vmatprep.subr.bf16.mxu0 %v4226_v34 }
 0x3b5   :  { %3181 = vmatpush3.bf16.msra.mxu0 %v4242_v38 }
 0x3b6   :  { %3183 = vmatprep.subr.bf16.mxu0 %v4246_v39 }
 0x3b9   :  { %3185 = vmatpush3.bf16.msra.mxu0 %v4262_v21 }
 0x3ba   :  { %3187 = vmatprep.subr.bf16.mxu0 %v4266_v22 }
 0x3bd   :  { %3189 = vmatpush3.bf16.msra.mxu0 %v4282_v49 }
 0x3be   :  { %2912 = vmatprep.subr.msk.mxu0 %vm255_vm1, %v2703_v23 }
 0x3c0   :  { %1468 = vmatmul.mubr.f32.vlgmr.msra.gmra.mrb[12].mxu0 %v4047_v42 }
 0x3c1   :  { %2913 = vmatpush3.msk.msra.mxu0 %vm255_vm1, %v2703_v23  ;;  %2914 = vmatprep.mubr.msk.f32.mxu0 %vm542_vm2, %v2475_v41 }
 0x3c4   :  { %2915 = vmatmul.mubr.msk.f32.vlgmr.msra.gmra.mrb[14].mxu0 %vm542_vm2, %v2476_v31 }
 0x3c5   :  { %2919 = vmatprep.mubr.msk.f32.mxu0 %vm542_vm2, %v2473_v62  ;;  %v2489_v62 = vld [vmem:[%s4642_s5 + $0x98] sm:$0xff] }
 0x403   :  { %v833_v32 = vpop.xlane.xlu0 %832 }
 0x404   :  { %v834_v35 = vrot.slane %v833_v32, 4 }
 0x406   :  { %v835_v36 = vadd.f32 %v834_v35, %v833_v32 }
 0x408   :  { %v836_v47 = vrot.slane %v835_v36, 2 }
 0x40a   :  { %v837_v51 = vadd.f32 %v836_v47, %v835_v36 }
 0x40c   :  { %v838_v42 = vrot.slane %v837_v51, 1 }
 0x40e   :  { %v839_v56 = vadd.f32 %v838_v42, %v837_v51  ;;  %v2491_v42 = vld [vmem:[%s4642_s5 + $0xa8] sm:$0xff] }
 0x410   :  { %3370 = vpush %v839_v56  ;;  %v2488_v56 = vld [vmem:[%s4642_s5 + $0x90] sm:$0xff] }
 0x473   :  { %v2911_v52 = vpop.f32.mrb[10].mxu0 }
 0x474   :  { %v1352_v54 = vsub.f32 %v2911_v52, %v1350_v46  ;;  %v1338_v60 = vpop.f32.mrb[11].mxu0 }
 0x475   :  { %v1351_v2 = vsub.f32 %v1338_v60, %v1349_v48 }
 0x476   :  { %v1354_v7 = vmul.f32 %v1352_v54, %v1352_v54 }
 0x477   :  { %v1353_v3 = vmul.f32 %v1351_v2, %v1351_v2 }
 0x478   :  { %v1357_v53 = vsel %vm1355_vm3, %v1354_v7, 0.0 }
 0x479   :  { %v1356_v14 = vsel %vm1355_vm3, %v1353_v3, 0.0 }
 0x47a   :  { %v1358_v15 = vadd.f32 %v1357_v53, %v1356_v14 }
 0x47c   :  { %1359 = vadd.xlane.f32.xlu1 %v1358_v15 }
 0x493   :  { %v2666_v23 = vpop.f32.mrb[12].mxu0 }
 0x494   :  { %v2667_v63 = vpop.f32.mrb[13].mxu0 }
 0x495   :  { %v2668_v24 = vadd.f32 %v2667_v63, %v2666_v23 }
 0x497   :  { %2917 = vmatprep.subr.msk.mxu0 %vm255_vm1, %v2668_v24 }
 0x498   :  { %2918 = vmatpush3.msk.msra.mxu0 %vm255_vm1, %v2668_v24 }
 0x499   :  { %2920 = vmatmul.mubr.msk.f32.vlgmr.msra.gmra.mrb[14].mxu0 %vm542_vm2, %v2474_v9  ;;  %3223 = vmatprep.subr.bf16.mxu0 %v4115_v5 }
 0x49a   :  { %3225 = vmatpush3.bf16.msra.mxu0 %v4138_v13  ;;  %1781 = vmatprep.mubr.f32.mxu0 %v4105_v1 }
 0x49b   :  { %3227 = vmatprep.subr.bf16.mxu0 %v4149_v57 }
 0x49e   :  { %3229 = vmatpush3.bf16.msra.mxu0 %v4161_v16 }
 0x49f   :  { %3231 = vmatprep.subr.bf16.mxu0 %v4165_v58 }
 0x4a2   :  { %3233 = vmatpush3.bf16.msra.mxu0 %v4182_v25  ;;  %v2483_v25 = vld [vmem:[%s4642_s5 + $0x80] sm:$0xff] }
 0x4a3   :  { %3235 = vmatprep.subr.bf16.mxu0 %v4186_v26 }
 0x4a6   :  { %3237 = vmatpush3.bf16.msra.mxu0 %v4202_v29 }
 0x4a7   :  { %3239 = vmatprep.subr.bf16.mxu0 %v4206_v30 }
 0x4aa   :  { %3241 = vmatpush3.bf16.msra.mxu0 %v4222_v33 }
 0x4ab   :  { %3243 = vmatprep.subr.bf16.mxu0 %v4226_v34 }
 0x4ae   :  { %3245 = vmatpush3.bf16.msra.mxu0 %v4242_v38  ;;  %v2484_v38 = vld [vmem:[%s4642_s5 + $0x88] sm:$0xff] }
 0x4af   :  { %3247 = vmatprep.subr.bf16.mxu0 %v4246_v39  ;;  %v1877_v39 = vld [vmem:[%s4648_s11 + $0x8] sm:$0xff] }
 0x4b2   :  { %3249 = vmatpush3.bf16.msra.mxu0 %v4262_v21  ;;  %v1876_v21 = vld [vmem:[%s4648_s11] sm:$0xff] }
 0x4b3   :  { %3251 = vmatprep.subr.bf16.mxu0 %v4266_v22 }
 0x4b6   :  { %3253 = vmatpush3.bf16.msra.mxu0 %v4282_v49 }
 0x4b9   :  { %1782 = vmatmul.mubr.f32.vlgmr.msra.gmra.mrb[16].mxu0 %v4103_v61 }
 0x4ba   :  { %2924 = vmatprep.mubr.msk.f32.mxu0 %vm542_vm2, %v2483_v25 }
 0x509   :  { %v1360_v5 = vpop.xlane.xlu1 %1359 }
 0x50a   :  { %v1361_v13 = vrot.slane %v1360_v5, 4 }
 0x50c   :  { %v1362_v57 = vadd.f32 %v1361_v13, %v1360_v5 }
 0x50e   :  { %v1363_v16 = vrot.slane %v1362_v57, 2 }
 0x510   :  { %v1364_v58 = vadd.f32 %v1363_v16, %v1362_v57 }
 0x512   :  { %v1365_v26 = vrot.slane %v1364_v58, 1 }
 0x514   :  { %v1366_v29 = vadd.f32 %v1365_v26, %v1364_v58 }
 0x516   :  { %3372 = vpush %v1366_v29 }
 0x58c   :  { %v2742_v30 = vpop.f32.mrb[16].mxu0 }
 0x58d   :  { %v2743_v33 = vpop.f32.mrb[17].mxu0 }
 0x58e   :  { %v2744_v34 = vadd.f32 %v2743_v33, %v2742_v30 }
 0x590   :  { %2922 = vmatprep.subr.msk.mxu0 %vm255_vm1, %v2744_v34 }
 0x591   :  { %2923 = vmatpush3.msk.msra.mxu0 %vm255_vm1, %v2744_v34 }
 0x592   :  { %2925 = vmatmul.mubr.msk.f32.vlgmr.msra.gmra.mrb[14].mxu0 %vm542_vm2, %v2484_v38  ;;  %3287 = vmatprep.subr.bf16.mxu0 %v4286_v50 }
 0x593   :  { %3289 = vmatpush3.bf16.msra.mxu0 %v4302_v55  ;;  %2067 = vmatprep.mubr.f32.mxu0 %v4049_v44  ;;  %v2490_v44 = vld [vmem:[%s4642_s5 + $0xa0] sm:$0xff] }
 0x594   :  { %3291 = vmatprep.subr.bf16.mxu0 %v4305_v59  ;;  %2929 = vmatprep.mubr.msk.f32.mxu1 %vm542_vm2, %v2490_v44 }
 0x597   :  { %3293 = vmatpush3.bf16.msra.mxu0 %v4322_v10 }
 0x598   :  { %3295 = vmatprep.subr.bf16.mxu0 %v4325_v12 }
 0x59b   :  { %3297 = vmatpush3.bf16.msra.mxu0 %v4340_v6 }
 0x59c   :  { %3299 = vmatprep.subr.bf16.mxu0 %v4343_v19 }
 0x59f   :  { %3301 = vmatpush3.bf16.msra.mxu0 %v4358_v27 }
 0x5a0   :  { %3303 = vmatprep.subr.bf16.mxu0 %v4361_v28 }
 0x5a3   :  { %3305 = vmatpush3.bf16.msra.mxu0 %v4376_v40 }
 0x5a4   :  { %3307 = vmatprep.subr.bf16.mxu0 %v4379_v43 }
 0x5a7   :  { %3309 = vmatpush3.bf16.msra.mxu0 %v4394_v17 }
 0x5a8   :  { %3311 = vmatprep.subr.bf16.mxu0 %v4397_v18 }
 0x5ab   :  { %3313 = vmatpush3.bf16.msra.mxu0 %v4412_v8 }
 0x5ac   :  { %3315 = vmatprep.subr.bf16.mxu0 %v4415_v11 }
 0x5af   :  { %3317 = vmatpush3.bf16.msra.mxu0 %v4424_v20 }
 0x5b2   :  { %2068 = vmatmul.mubr.f32.vlgmr.msra.gmra.mrb[18].mxu0 %v4051_v45 }
 0x665   :  { %v2926_v22 = vpop.f32.mrb[14].mxu0 }
 0x666   :  { %v1879_v49 = vsub.f32 %v2926_v22, %v1877_v39  ;;  %v1865_v0 = vpop.f32.mrb[15].mxu0 }
 0x667   :  { %v1878_v4 = vsub.f32 %v1865_v0, %v1876_v21 }
 0x668   :  { %v1881_v45 = vmul.f32 %v1879_v49, %v1879_v49 }
 0x669   :  { %v1880_v41 = vmul.f32 %v1878_v4, %v1878_v4 }
 0x66a   :  { %v1884_v31 = vsel %vm1882_vm4, %v1881_v45, 0.0 }
 0x66b   :  { %v1883_v32 = vsel %vm1882_vm4, %v1880_v41, 0.0 }
 0x66c   :  { %v1885_v35 = vadd.f32 %v1884_v31, %v1883_v32 }
 0x66e   :  { %1886 = vadd.xlane.f32.xlu0 %v1885_v35 }
 0x685   :  { %v2815_v36 = vpop.f32.mrb[18].mxu0 }
 0x686   :  { %v2816_v47 = vpop.f32.mrb[19].mxu0 }
 0x687   :  { %v2817_v51 = vadd.f32 %v2816_v47, %v2815_v36 }
 0x689   :  { %2927 = vmatprep.subr.msk.mxu1 %vm255_vm1, %v2817_v51 }
 0x68a   :  { %2928 = vmatpush3.msk.msra.mxu1 %vm255_vm1, %v2817_v51 }
 0x68b   :  { %2930 = vmatmul.mubr.msk.f32.vlgmr.msra.gmra.mrb[12].mxu1 %vm542_vm2, %v2491_v42  ;;  %2932 = vmatprep.subr.msk.mxu1 %vm255_vm1, %v4481_v37 }
 0x68c   :  { %2933 = vmatpush3.msk.msra.mxu1 %vm255_vm1, %v4481_v37  ;;  %2934 = vmatprep.mubr.msk.f32.mxu1 %vm542_vm2, %v2488_v56 }
 0x68d   :  { %3319 = vmatprep.subr.bf16.mxu1 %v4286_v50 }
 0x693   :  { %2935 = vmatmul.mubr.msk.f32.vlgmr.msra.gmra.mrb[12].mxu1 %vm542_vm2, %v2489_v62 }
 0x694   :  { %3321 = vmatpush3.bf16.msra.mxu1 %v4302_v55  ;;  %2308 = vmatprep.mubr.f32.mxu1 %v4105_v1 }
 0x695   :  { %3323 = vmatprep.subr.bf16.mxu1 %v4305_v59 }
 0x698   :  { %3325 = vmatpush3.bf16.msra.mxu1 %v4322_v10 }
 0x699   :  { %3327 = vmatprep.subr.bf16.mxu1 %v4325_v12 }
 0x69c   :  { %3329 = vmatpush3.bf16.msra.mxu1 %v4340_v6 }
 0x69d   :  { %3331 = vmatprep.subr.bf16.mxu1 %v4343_v19  ;;  %v2498_v19 = vld [vmem:[%s4642_s5 + $0xb0] sm:$0xff] }
 0x6a0   :  { %3333 = vmatpush3.bf16.msra.mxu1 %v4358_v27 }
 0x6a1   :  { %3335 = vmatprep.subr.bf16.mxu1 %v4361_v28 }
 0x6a4   :  { %3337 = vmatpush3.bf16.msra.mxu1 %v4376_v40 }
 0x6a5   :  { %3339 = vmatprep.subr.bf16.mxu1 %v4379_v43  ;;  %v2404_v43 = vld [vmem:[%s4649_s12 + $0x8] sm:$0xff] }
 0x6a8   :  { %3341 = vmatpush3.bf16.msra.mxu1 %v4394_v17  ;;  %v2403_v17 = vld [vmem:[%s4649_s12] sm:$0xff] }
 0x6a9   :  { %3343 = vmatprep.subr.bf16.mxu1 %v4397_v18 }
 0x6ac   :  { %3345 = vmatpush3.bf16.msra.mxu1 %v4412_v8 }
 0x6ad   :  { %3347 = vmatprep.subr.bf16.mxu1 %v4415_v11 }
 0x6b0   :  { %3349 = vmatpush3.bf16.msra.mxu1 %v4424_v20 }
 0x6b3   :  { %2309 = vmatmul.mubr.f32.vlgmr.msra.gmra.mrb[14].mxu1 %v4103_v61  ;;  %v2499_v61 = vld [vmem:[%s4642_s5 + $0xb8] sm:$0xff]  ;;  %s3371_s5 = spop %3370 }
 0x6b4   :  { %2939 = vmatprep.mubr.msk.f32.mxu1 %vm542_vm2, %v2498_v19  ;;  %s3373_s12 = spop %3372  ;;  %v841_v63 = vstv %s3371_s5 }
 0x6b5   :  { %v1368_v23 = vstv %s3373_s12  ;;  %v842_v5 = vmul.f32 0.00024414063, %v841_v63 }
 0x6b6   :  { %v1369_v9 = vmul.f32 0.0009765625, %v1368_v23 }
 0x6b8   :  { %v1370_v57 = vadd.f32 %v1369_v9, %v842_v5 }
 0x6fb   :  { %v1887_v1 = vpop.xlane.xlu0 %1886 }
 0x6fc   :  { %v1888_v50 = vrot.slane %v1887_v1, 4 }
 0x6fe   :  { %v1889_v55 = vadd.f32 %v1888_v50, %v1887_v1 }
 0x700   :  { %v1890_v59 = vrot.slane %v1889_v55, 2 }
 0x702   :  { %v1891_v10 = vadd.f32 %v1890_v59, %v1889_v55 }
 0x704   :  { %v1892_v12 = vrot.slane %v1891_v10, 1 }
 0x706   :  { %v1893_v6 = vadd.f32 %v1892_v12, %v1891_v10 }
 0x708   :  { %3374 = vpush %v1893_v6 }
 0x739   :  { %s3375_s8 = spop %3374 }
 0x73a   :  { %v1895_v24 = vstv %s3375_s8 }
 0x73b   :  { %v1896_v13 = vmul.f32 0.00390625, %v1895_v24 }
 0x73d   :  { %v1897_v58 = vadd.f32 %v1896_v13, %v1370_v57 }
 0x786   :  { %v2856_v27 = vpop.f32.mrb[14].mxu1 }
 0x787   :  { %v2857_v28 = vpop.f32.mrb[15].mxu1 }
 0x788   :  { %v2858_v40 = vadd.f32 %v2857_v28, %v2856_v27 }
 0x78a   :  { %2937 = vmatprep.subr.msk.mxu1 %vm255_vm1, %v2858_v40 }
 0x78b   :  { %2938 = vmatpush3.msk.msra.mxu1 %vm255_vm1, %v2858_v40 }
 0x78c   :  { %2940 = vmatmul.mubr.msk.f32.vlgmr.msra.gmra.mrb[12].mxu1 %vm542_vm2, %v2499_v61 }
 0x85f   :  { %v2941_v18 = vpop.f32.mrb[12].mxu1 }
 0x860   :  { %v2406_v8 = vsub.f32 %v2941_v18, %v2404_v43  ;;  %v2392_v11 = vpop.f32.mrb[13].mxu1 }
 0x861   :  { %v2405_v20 = vsub.f32 %v2392_v11, %v2403_v17 }
 0x862   :  { %v2408_v37 = vmul.f32 %v2406_v8, %v2406_v8 }
 0x863   :  { %v2407_v46 = vmul.f32 %v2405_v20, %v2405_v20 }
 0x864   :  { %v2411_v48 = vsel %vm2409_vm5, %v2408_v37, 0.0 }
 0x865   :  { %v2410_v52 = vsel %vm2409_vm5, %v2407_v46, 0.0 }
 0x866   :  { %v2412_v54 = vadd.f32 %v2411_v48, %v2410_v52 }
 0x868   :  { %2413 = vadd.xlane.f32.xlu1 %v2412_v54 }
 0x8f5   :  { %v2414_v60 = vpop.xlane.xlu1 %2413 }
 0x8f6   :  { %v2415_v2 = vrot.slane %v2414_v60, 4 }
 0x8f8   :  { %v2416_v7 = vadd.f32 %v2415_v2, %v2414_v60 }
 0x8fa   :  { %v2417_v3 = vrot.slane %v2416_v7, 2 }
 0x8fc   :  { %v2418_v53 = vadd.f32 %v2417_v3, %v2416_v7 }
 0x8fe   :  { %v2419_v14 = vrot.slane %v2418_v53, 1 }
 0x900   :  { %v2420_v15 = vadd.f32 %v2419_v14, %v2418_v53 }
 0x902   :  { %3376 = vpush %v2420_v15 }
 0x933   :  { %s3377_s3 = spop %3376 }
 0x934   :  { %v2422_v16 = vstv %s3377_s3 }
 0x935   :  { %v2423_v25 = vmul.f32 0.015625, %v2422_v16 }
 0x937   :  { %v2424_v26 = vadd.f32 %v2423_v25, %v1897_v58 }
 0x939   :  { %2426 = vst.msk [vmem:[#allocation2] sm:$0x1] %vm2425_vm6, %v2424_v26 }
 0x93a   :  { %3399 = shalt.err (!%p3396_p4)
}
 0x93b   :  { %s3400_s23 = scalar_lea.hbm %s4650_s13, 16 }
 0x93c   :  { %p3401_p5 = scmp.ne.s32.totalorder %s4650_s13, %s3400_s23  ;;  %p3404_p6 = scmp.lt.u32.totalorder %s3400_s23, %s4650_s13 }
 0x93e   :  { %p3406_p7 = pnand %p3404_p6, %p3401_p5 }
 0x940   :  { %3409 = shalt.err (!%p3406_p7)
}
 0x941   :  { %2436 = dma.vmem_to_hbm [thread:$0]  %s2434_s21, 16, %s4650_s13, [#allocation3]  }
 0x942   :  { %3410 = dma.done.wait [#allocation3], 16  }
 0x943   :  { %3411 = vsyncadd [#allocation3], 4294967280 }
 0x944   :  { %2440 = vsyncpa [#allocation3], 1 }

</bundles_post_ra>
